<compile_context>
chip_gen: v7x
topology: tpu7x:2x2x1
jax: 0.10.0
libtpu: 0.0.40
codegen_flags: <defaults>
</compile_context>

<pallas_src>
import jax
import jax.numpy as jnp
from jax import lax
from jax.experimental import pallas as pl
from jax.experimental.pallas import tpu as pltpu

# ----------------------------- problem dims --------------------------------
B, C_IN, H, W = 2, 3, 16, 16
HW = H * W                                    # 256 pixels per image
L = B * HW                                    # 512 lanes: batch folded onto lanes
D_L, D_G, WC = 6, 8, 4                        # Local / Global / Periodic (wave count)
D_LAT = D_L + D_G + WC
D_OUT = 10                                    # SVBRDF maps (2 normal angles + 8 params)
N_FUSE = 3 * WC + D_OUT                       # rows of the fused gvec-contraction block

# ------------------------------ slab layout ---------------------------------
# One f32 [SLAB_ROWS, L] slab holds every weight/bias plus the constant
# spatial-index planes and per-batch lane masks.  Static ref slices inside the
# kernel; packed ONCE per parameter set; single DMA.
R_HH = 0                          # row 0: hh plane (pixel row index), tiled over batch
R_WW = 1                          # row 1: ww plane (pixel col index), tiled over batch
R_MASK = 2                        # rows 2..2+B-1: per-batch 0/1 lane masks
R_LOC = R_MASK + B                # D_L rows : cols 0..2 = W_local^T, col 3 = b_local
R_GLB = R_LOC + D_L               # C_IN rows = W_global ; next row = b_global
R_FUSE = R_GLB + C_IN + 1         # N_FUSE rows: cols 0..D_G-1 = [Wph;Wpw;Wpc;Wdec_glb^T],
                                  #              col D_G = [bph;bpw;bpc;b_dec]
R_DECPIX = R_FUSE + N_FUSE        # D_OUT rows: cols 0..D_L-1 = Wdec_local^T,
                                  #             cols D_L..D_L+WC-1 = Wdec_periodic^T
SLAB_ROWS = ((R_DECPIX + D_OUT + 7) // 8) * 8       # -> 48


# ------------------------------- kernel ------------------------------------
def _svbrdf_kernel(x_ref, w_ref, o_ref):
    # Constant pixel-index planes (pixels on lanes; lane = b*HW + p).
    hh = w_ref[R_HH:R_HH + 1, :]                                   # [1, L]
    ww = w_ref[R_WW:R_WW + 1, :]                                   # [1, L]

    # Weight views -- loaded / broadcast ONCE (no per-batch duplication).
    wl_cols = [w_ref[R_LOC:R_LOC + D_L, c:c + 1] for c in range(C_IN)]        # [D_L,1]
    bl = w_ref[R_LOC:R_LOC + D_L, C_IN:C_IN + 1]                              # [D_L,1]
    wg = w_ref[R_GLB:R_GLB + C_IN, 0:D_G]                                     # [C_IN,D_G]
    bg = w_ref[R_GLB + C_IN:R_GLB + C_IN + 1, 0:D_G]                          # [1,D_G]
    fw = w_ref[R_FUSE:R_FUSE + N_FUSE, 0:D_G]                                 # [N_FUSE,D_G]
    fb = w_ref[R_FUSE:R_FUSE + N_FUSE, D_G:D_G + 1]                           # [N_FUSE,1]
    wdl_cols = [w_ref[R_DECPIX:R_DECPIX + D_OUT, d:d + 1] for d in range(D_L)]
    wdp_cols = [w_ref[R_DECPIX:R_DECPIX + D_OUT, D_L + k:D_L + k + 1]
                for k in range(WC)]

    x = x_ref[...]                                                 # [C_IN, L]

    # --- per-batch prologue (tiny): pool -> gvec -> ONE fused contraction ---
    wave_h_f = wave_w_f = wave_c_f = dec0_f = None
    for b in range(B):
        xb = x[:, b * HW:(b + 1) * HW]                             # [C_IN, HW]
        pooled = jnp.mean(xb, axis=1, keepdims=True)               # [C_IN, 1]
        gvec = jnp.tanh(jnp.sum(pooled * wg, axis=0, keepdims=True) + bg)  # [1, D_G]
        # Single multiply + single cross-lane reduce covers wave_h/wave_w/wave_c
        # and the pixel-constant decoder part (global field + bias).
        fused = jnp.sum(fw * gvec, axis=1, keepdims=True) + fb     # [N_FUSE, 1]
        wh = fused[0:WC]
        wv = fused[WC:2 * WC]
        wc = fused[2 * WC:3 * WC]
        d0 = fused[3 * WC:3 * WC + D_OUT]
        mask = w_ref[R_MASK + b:R_MASK + b + 1, :]                 # [1, L]
        if b == 0:
            wave_h_f, wave_w_f, wave_c_f = wh * mask, wv * mask, wc * mask
            dec0_f = d0 * mask
        else:
            wave_h_f = wave_h_f + wh * mask
            wave_w_f = wave_w_f + wv * mask
            wave_c_f = wave_c_f + wc * mask
            dec0_f = dec0_f + d0 * mask

    # ------------ pixel path: runs ONCE on lane-dense [*, L] tiles -----------
    # Local encoder: 1x1 conv + ReLU (unrolled VPU broadcast FMAs).
    local = wl_cols[0] * x[0:1, :]
    for c in range(1, C_IN):
        local = local + wl_cols[c] * x[c:c + 1, :]
    local = jnp.maximum(local + bl, 0.0)                           # [D_L, L]

    # Periodic encoder: planar wave + sin (single EUP pass).
    periodic = jnp.sin(wave_h_f * hh + wave_w_f * ww + wave_c_f)   # [WC, L]

    # Decoder: concat folded into split weight columns; the pixel-constant
    # (global + bias) contribution already sits in dec0_f.  Two independent
    # partial accumulators break the serial add chain.
    terms = [dec0_f]
    terms += [wdl_cols[d] * local[d:d + 1, :] for d in range(D_L)]
    terms += [wdp_cols[k] * periodic[k:k + 1, :] for k in range(WC)]
    acc0, acc1 = terms[0], terms[1]
    for i, t in enumerate(terms[2:]):
        if i % 2 == 0:
            acc0 = acc0 + t
        else:
            acc1 = acc1 + t
    dec = acc0 + acc1                                              # [D_OUT, L]

    # Sigmoid in tanh form: one EUP pass, numerically safe for large |dec|.
    out = 0.5 * jnp.tanh(0.5 * dec) + 0.5

    # Lane-dense stores: one [D_OUT, HW] slab per batch (lane offsets are
    # multiples of 256, so no relayout).
    for b in range(B):
        o_ref[b] = out[:, b * HW:(b + 1) * HW]


# ------------------------------- packing ------------------------------------
def pack_slab(P):
    """Pack all parameters + index planes + batch masks into one [SLAB_ROWS, L]
    f32 slab.  Depends only on the parameters -> call once and reuse."""
    slab = jnp.zeros((SLAB_ROWS, L), jnp.float32)
    hh = jnp.repeat(jnp.arange(H, dtype=jnp.float32), W)        # p // W (row-major)
    ww = jnp.tile(jnp.arange(W, dtype=jnp.float32), H)          # p %  W
    slab = slab.at[R_HH, :].set(jnp.tile(hh, B))
    slab = slab.at[R_WW, :].set(jnp.tile(ww, B))
    lane_b = jnp.repeat(jnp.arange(B), HW)                       # lane -> batch id
    for b in range(B):
        slab = slab.at[R_MASK + b, :].set((lane_b == b).astype(jnp.float32))
    slab = slab.at[R_LOC:R_LOC + D_L, 0:C_IN].set(P['W_local'].T)
    slab = slab.at[R_LOC:R_LOC + D_L, C_IN].set(P['b_local'])
    slab = slab.at[R_GLB:R_GLB + C_IN, 0:D_G].set(P['W_global'])
    slab = slab.at[R_GLB + C_IN, 0:D_G].set(P['b_global'])
    # Fused gvec-contraction block.  Column 3*k + j of the Periodic linear is
    # wave k, coordinate j (h, w, const); the decoder's global-field columns
    # ride along so everything comes out of one reduce.
    fused_w = jnp.concatenate([P['W_per'][:, 0::3].T,
                               P['W_per'][:, 1::3].T,
                               P['W_per'][:, 2::3].T,
                               P['W_dec'][D_L:D_L + D_G, :].T], axis=0)   # [N_FUSE, D_G]
    fused_b = jnp.concatenate([P['b_per'][0::3], P['b_per'][1::3],
                               P['b_per'][2::3], P['b_dec']], axis=0)     # [N_FUSE]
    slab = slab.at[R_FUSE:R_FUSE + N_FUSE, 0:D_G].set(fused_w)
    slab = slab.at[R_FUSE:R_FUSE + N_FUSE, D_G].set(fused_b)
    # Decoder pixel-varying columns: local part then periodic part.
    slab = slab.at[R_DECPIX:R_DECPIX + D_OUT, 0:D_L].set(P['W_dec'][0:D_L, :].T)
    slab = slab.at[R_DECPIX:R_DECPIX + D_OUT, D_L:D_L + WC].set(
        P['W_dec'][D_L + D_G:D_LAT, :].T)
    return slab


# ------------------------------- wrapper ------------------------------------
@jax.jit
def svbrdf_forward(images_nchw, slab):
    """images_nchw: [B, 3, H, W] (PyTorch layout). slab: pack_slab(params).
    Returns [B, D_OUT, H, W]."""
    # NCHW -> [C_IN, B*HW]: batch folded onto the lane axis (batch-major).
    x = images_nchw.astype(jnp.float32).reshape(B, C_IN, HW)
    x = jnp.transpose(x, (1, 0, 2)).reshape(C_IN, L)

    out = pl.pallas_call(
        _svbrdf_kernel,
        out_shape=jax.ShapeDtypeStruct((B, D_OUT, HW), jnp.float32),
        in_specs=[pl.BlockSpec(memory_space=pltpu.MemorySpace.VMEM),
                  pl.BlockSpec(memory_space=pltpu.MemorySpace.VMEM)],
        out_specs=pl.BlockSpec(memory_space=pltpu.MemorySpace.VMEM),
    )(x, slab)

    return out.reshape(B, D_OUT, H, W)


# ----------------------- pure-JAX reference (torch semantics) ---------------
def reference_forward(images_nchw, P):
    hi = lax.Precision.HIGHEST
    b = images_nchw.shape[0]
    x = jnp.transpose(images_nchw, (0, 2, 3, 1)).reshape(b, HW, C_IN)
    local = jnp.maximum(
        jnp.einsum('bpc,cd->bpd', x, P['W_local'], precision=hi) + P['b_local'], 0.0)
    pooled = jnp.mean(x, axis=1)
    gvec = jnp.tanh(jnp.einsum('bc,cd->bd', pooled, P['W_global'], precision=hi)
                    + P['b_global'])
    gfield = jnp.broadcast_to(gvec[:, None, :], (b, HW, D_G))
    wave = jnp.einsum('bd,de->be', gvec, P['W_per'], precision=hi) + P['b_per']
    wave_mat = wave.reshape(b, WC, 3)                        # torch .view(B, WC, 3)
    mh, mw = jnp.meshgrid(jnp.arange(H, dtype=jnp.float32),
                          jnp.arange(W, dtype=jnp.float32), indexing='ij')
    idx = jnp.stack([mh, mw, jnp.ones_like(mh)], axis=-1).reshape(HW, 3)
    periodic = jnp.sin(jnp.einsum('bkj,pj->bpk', wave_mat, idx, precision=hi))
    latents = jnp.concatenate([local, gfield, periodic], axis=-1)
    out = jax.nn.sigmoid(
        jnp.einsum('bpd,de->bpe', latents, P['W_dec'], precision=hi) + P['b_dec'])
    return jnp.transpose(out.reshape(b, H, W, D_OUT), (0, 3, 1, 2))


# ------------------------------- params -------------------------------------
def init_params(key):
    ks = jax.random.split(key, 8)
    s = 0.2
    return dict(
        W_local=jax.random.normal(ks[0], (C_IN, D_L), jnp.float32) * s,
        b_local=jax.random.normal(ks[1], (D_L,), jnp.float32) * s,
        W_global=jax.random.normal(ks[2], (C_IN, D_G), jnp.float32) * s,
        b_global=jax.random.normal(ks[3], (D_G,), jnp.float32) * s,
        W_per=jax.random.normal(ks[4], (D_G, 3 * WC), jnp.float32) * s,
        b_per=jax.random.normal(ks[5], (3 * WC,), jnp.float32) * s,
        W_dec=jax.random.normal(ks[6], (D_LAT, D_OUT), jnp.float32) * s,
        b_dec=jax.random.normal(ks[7], (D_OUT,), jnp.float32) * s,
    )


if __name__ == "__main__":
    key = jax.random.PRNGKey(0)
    pkey, xkey = jax.random.split(key)
    params = init_params(pkey)
    images = jax.random.uniform(xkey, (B, C_IN, H, W), jnp.float32)

    # Slab packed once per parameter set (image-independent), reused per call.
    slab = jax.block_until_ready(pack_slab(params))

    out = svbrdf_forward(images, slab)
    out = jax.block_until_ready(out)

    ref = reference_forward(images, params)
    assert out.shape == (B, D_OUT, H, W), out.shape
    assert jnp.allclose(out, ref, atol=1e-2, rtol=1e-2), \
        float(jnp.max(jnp.abs(out - ref)))
    print("KERNEL_OK")
</pallas_src>

<mosaic_0001>
module attributes {stable_mosaic.version = 11 : i64} {
  func.func @_svbrdf_kernel(%arg0: memref<3x512xf32, #tpu.memory_space<vmem>>, %arg1: memref<48x512xf32, #tpu.memory_space<vmem>>, %arg2: memref<2x10x256xf32, #tpu.memory_space<vmem>>) attributes {dimension_semantics = [], scalar_prefetch = 0 : i64, scratch_operands = 0 : i64, tpu.core_type = #tpu.core_type<tc>} {
    %c0 = arith.constant 0 : index
    %c0_0 = arith.constant 0 : index
    %0 = vector.load %arg1[%c0, %c0_0] : memref<48x512xf32, #tpu.memory_space<vmem>>, vector<1x512xf32>
    %c1 = arith.constant 1 : index
    %c0_1 = arith.constant 0 : index
    %1 = vector.load %arg1[%c1, %c0_1] : memref<48x512xf32, #tpu.memory_space<vmem>>, vector<1x512xf32>
    %c4 = arith.constant 4 : index
    %c0_2 = arith.constant 0 : index
    %2 = vector.load %arg1[%c4, %c0_2] : memref<48x512xf32, #tpu.memory_space<vmem>>, vector<6x1xf32>
    %c4_3 = arith.constant 4 : index
    %c1_4 = arith.constant 1 : index
    %3 = vector.load %arg1[%c4_3, %c1_4] : memref<48x512xf32, #tpu.memory_space<vmem>>, vector<6x1xf32>
    %c4_5 = arith.constant 4 : index
    %c2 = arith.constant 2 : index
    %4 = vector.load %arg1[%c4_5, %c2] : memref<48x512xf32, #tpu.memory_space<vmem>>, vector<6x1xf32>
    %c4_6 = arith.constant 4 : index
    %c3 = arith.constant 3 : index
    %5 = vector.load %arg1[%c4_6, %c3] : memref<48x512xf32, #tpu.memory_space<vmem>>, vector<6x1xf32>
    %c10 = arith.constant 10 : index
    %c0_7 = arith.constant 0 : index
    %6 = vector.load %arg1[%c10, %c0_7] : memref<48x512xf32, #tpu.memory_space<vmem>>, vector<3x8xf32>
    %c13 = arith.constant 13 : index
    %c0_8 = arith.constant 0 : index
    %7 = vector.load %arg1[%c13, %c0_8] : memref<48x512xf32, #tpu.memory_space<vmem>>, vector<1x8xf32>
    %c14 = arith.constant 14 : index
    %c0_9 = arith.constant 0 : index
    %8 = vector.load %arg1[%c14, %c0_9] : memref<48x512xf32, #tpu.memory_space<vmem>>, vector<22x8xf32>
    %c14_10 = arith.constant 14 : index
    %c8 = arith.constant 8 : index
    %9 = vector.load %arg1[%c14_10, %c8] : memref<48x512xf32, #tpu.memory_space<vmem>>, vector<22x1xf32>
    %c36 = arith.constant 36 : index
    %c0_11 = arith.constant 0 : index
    %10 = vector.load %arg1[%c36, %c0_11] : memref<48x512xf32, #tpu.memory_space<vmem>>, vector<10x1xf32>
    %c36_12 = arith.constant 36 : index
    %c1_13 = arith.constant 1 : index
    %11 = vector.load %arg1[%c36_12, %c1_13] : memref<48x512xf32, #tpu.memory_space<vmem>>, vector<10x1xf32>
    %c36_14 = arith.constant 36 : index
    %c2_15 = arith.constant 2 : index
    %12 = vector.load %arg1[%c36_14, %c2_15] : memref<48x512xf32, #tpu.memory_space<vmem>>, vector<10x1xf32>
    %c36_16 = arith.constant 36 : index
    %c3_17 = arith.constant 3 : index
    %13 = vector.load %arg1[%c36_16, %c3_17] : memref<48x512xf32, #tpu.memory_space<vmem>>, vector<10x1xf32>
    %c36_18 = arith.constant 36 : index
    %c4_19 = arith.constant 4 : index
    %14 = vector.load %arg1[%c36_18, %c4_19] : memref<48x512xf32, #tpu.memory_space<vmem>>, vector<10x1xf32>
    %c36_20 = arith.constant 36 : index
    %c5 = arith.constant 5 : index
    %15 = vector.load %arg1[%c36_20, %c5] : memref<48x512xf32, #tpu.memory_space<vmem>>, vector<10x1xf32>
    %c36_21 = arith.constant 36 : index
    %c6 = arith.constant 6 : index
    %16 = vector.load %arg1[%c36_21, %c6] : memref<48x512xf32, #tpu.memory_space<vmem>>, vector<10x1xf32>
    %c36_22 = arith.constant 36 : index
    %c7 = arith.constant 7 : index
    %17 = vector.load %arg1[%c36_22, %c7] : memref<48x512xf32, #tpu.memory_space<vmem>>, vector<10x1xf32>
    %c36_23 = arith.constant 36 : index
    %c8_24 = arith.constant 8 : index
    %18 = vector.load %arg1[%c36_23, %c8_24] : memref<48x512xf32, #tpu.memory_space<vmem>>, vector<10x1xf32>
    %c36_25 = arith.constant 36 : index
    %c9 = arith.constant 9 : index
    %19 = vector.load %arg1[%c36_25, %c9] : memref<48x512xf32, #tpu.memory_space<vmem>>, vector<10x1xf32>
    %c0_26 = arith.constant 0 : index
    %c0_27 = arith.constant 0 : index
    %20 = vector.load %arg0[%c0_26, %c0_27] : memref<3x512xf32, #tpu.memory_space<vmem>>, vector<3x512xf32>
    %21 = vector.extract_strided_slice %20 {offsets = [0, 0], sizes = [3, 256], strides = [1, 1]} : vector<3x512xf32> to vector<3x256xf32>
    %cst = arith.constant dense<0.000000e+00> : vector<3xf32>
    %22 = vector.multi_reduction <add>, %21, %cst [1] : vector<3x256xf32> to vector<3xf32>
    %23 = vector.shape_cast %22 : vector<3xf32> to vector<3x1xf32>
    %cst_28 = arith.constant 2.560000e+02 : f32
    %24 = vector.broadcast %cst_28 : f32 to vector<3x1xf32>
    %25 = arith.divf %23, %24 : vector<3x1xf32>
    %26 = vector.broadcast %25 : vector<3x1xf32> to vector<3x8xf32>
    %27 = arith.mulf %26, %6 : vector<3x8xf32>
    %cst_29 = arith.constant dense<0.000000e+00> : vector<8xf32>
    %28 = vector.multi_reduction <add>, %27, %cst_29 [0] : vector<3x8xf32> to vector<8xf32>
    %29 = vector.shape_cast %28 : vector<8xf32> to vector<1x8xf32>
    %30 = arith.addf %29, %7 : vector<1x8xf32>
    %31 = math.tanh %30 : vector<1x8xf32>
    %32 = vector.broadcast %31 : vector<1x8xf32> to vector<22x8xf32>
    %33 = arith.mulf %8, %32 : vector<22x8xf32>
    %cst_30 = arith.constant dense<0.000000e+00> : vector<22xf32>
    %34 = vector.multi_reduction <add>, %33, %cst_30 [1] : vector<22x8xf32> to vector<22xf32>
    %35 = vector.shape_cast %34 : vector<22xf32> to vector<22x1xf32>
    %36 = arith.addf %35, %9 : vector<22x1xf32>
    %37 = vector.extract_strided_slice %36 {offsets = [0, 0], sizes = [4, 1], strides = [1, 1]} : vector<22x1xf32> to vector<4x1xf32>
    %38 = vector.extract_strided_slice %36 {offsets = [4, 0], sizes = [4, 1], strides = [1, 1]} : vector<22x1xf32> to vector<4x1xf32>
    %39 = vector.extract_strided_slice %36 {offsets = [8, 0], sizes = [4, 1], strides = [1, 1]} : vector<22x1xf32> to vector<4x1xf32>
    %40 = vector.extract_strided_slice %36 {offsets = [12, 0], sizes = [10, 1], strides = [1, 1]} : vector<22x1xf32> to vector<10x1xf32>
    %c2_31 = arith.constant 2 : index
    %c0_32 = arith.constant 0 : index
    %41 = vector.load %arg1[%c2_31, %c0_32] : memref<48x512xf32, #tpu.memory_space<vmem>>, vector<1x512xf32>
    %42 = vector.broadcast %37 : vector<4x1xf32> to vector<4x512xf32>
    %43 = vector.broadcast %41 : vector<1x512xf32> to vector<4x512xf32>
    %44 = arith.mulf %42, %43 : vector<4x512xf32>
    %45 = vector.broadcast %38 : vector<4x1xf32> to vector<4x512xf32>
    %46 = vector.broadcast %41 : vector<1x512xf32> to vector<4x512xf32>
    %47 = arith.mulf %45, %46 : vector<4x512xf32>
    %48 = vector.broadcast %39 : vector<4x1xf32> to vector<4x512xf32>
    %49 = vector.broadcast %41 : vector<1x512xf32> to vector<4x512xf32>
    %50 = arith.mulf %48, %49 : vector<4x512xf32>
    %51 = vector.broadcast %40 : vector<10x1xf32> to vector<10x512xf32>
    %52 = vector.broadcast %41 : vector<1x512xf32> to vector<10x512xf32>
    %53 = arith.mulf %51, %52 : vector<10x512xf32>
    %54 = vector.extract_strided_slice %20 {offsets = [0, 256], sizes = [3, 256], strides = [1, 1]} : vector<3x512xf32> to vector<3x256xf32>
    %cst_33 = arith.constant dense<0.000000e+00> : vector<3xf32>
    %55 = vector.multi_reduction <add>, %54, %cst_33 [1] : vector<3x256xf32> to vector<3xf32>
    %56 = vector.shape_cast %55 : vector<3xf32> to vector<3x1xf32>
    %cst_34 = arith.constant 2.560000e+02 : f32
    %57 = vector.broadcast %cst_34 : f32 to vector<3x1xf32>
    %58 = arith.divf %56, %57 : vector<3x1xf32>
    %59 = vector.broadcast %58 : vector<3x1xf32> to vector<3x8xf32>
    %60 = arith.mulf %59, %6 : vector<3x8xf32>
    %cst_35 = arith.constant dense<0.000000e+00> : vector<8xf32>
    %61 = vector.multi_reduction <add>, %60, %cst_35 [0] : vector<3x8xf32> to vector<8xf32>
    %62 = vector.shape_cast %61 : vector<8xf32> to vector<1x8xf32>
    %63 = arith.addf %62, %7 : vector<1x8xf32>
    %64 = math.tanh %63 : vector<1x8xf32>
    %65 = vector.broadcast %64 : vector<1x8xf32> to vector<22x8xf32>
    %66 = arith.mulf %8, %65 : vector<22x8xf32>
    %cst_36 = arith.constant dense<0.000000e+00> : vector<22xf32>
    %67 = vector.multi_reduction <add>, %66, %cst_36 [1] : vector<22x8xf32> to vector<22xf32>
    %68 = vector.shape_cast %67 : vector<22xf32> to vector<22x1xf32>
    %69 = arith.addf %68, %9 : vector<22x1xf32>
    %70 = vector.extract_strided_slice %69 {offsets = [0, 0], sizes = [4, 1], strides = [1, 1]} : vector<22x1xf32> to vector<4x1xf32>
    %71 = vector.extract_strided_slice %69 {offsets = [4, 0], sizes = [4, 1], strides = [1, 1]} : vector<22x1xf32> to vector<4x1xf32>
    %72 = vector.extract_strided_slice %69 {offsets = [8, 0], sizes = [4, 1], strides = [1, 1]} : vector<22x1xf32> to vector<4x1xf32>
    %73 = vector.extract_strided_slice %69 {offsets = [12, 0], sizes = [10, 1], strides = [1, 1]} : vector<22x1xf32> to vector<10x1xf32>
    %c3_37 = arith.constant 3 : index
    %c0_38 = arith.constant 0 : index
    %74 = vector.load %arg1[%c3_37, %c0_38] : memref<48x512xf32, #tpu.memory_space<vmem>>, vector<1x512xf32>
    %75 = vector.broadcast %70 : vector<4x1xf32> to vector<4x512xf32>
    %76 = vector.broadcast %74 : vector<1x512xf32> to vector<4x512xf32>
    %77 = arith.mulf %75, %76 : vector<4x512xf32>
    %78 = arith.addf %44, %77 : vector<4x512xf32>
    %79 = vector.broadcast %71 : vector<4x1xf32> to vector<4x512xf32>
    %80 = vector.broadcast %74 : vector<1x512xf32> to vector<4x512xf32>
    %81 = arith.mulf %79, %80 : vector<4x512xf32>
    %82 = arith.addf %47, %81 : vector<4x512xf32>
    %83 = vector.broadcast %72 : vector<4x1xf32> to vector<4x512xf32>
    %84 = vector.broadcast %74 : vector<1x512xf32> to vector<4x512xf32>
    %85 = arith.mulf %83, %84 : vector<4x512xf32>
    %86 = arith.addf %50, %85 : vector<4x512xf32>
    %87 = vector.broadcast %73 : vector<10x1xf32> to vector<10x512xf32>
    %88 = vector.broadcast %74 : vector<1x512xf32> to vector<10x512xf32>
    %89 = arith.mulf %87, %88 : vector<10x512xf32>
    %90 = arith.addf %53, %89 : vector<10x512xf32>
    %91 = vector.extract_strided_slice %20 {offsets = [0, 0], sizes = [1, 512], strides = [1, 1]} : vector<3x512xf32> to vector<1x512xf32>
    %92 = vector.broadcast %2 : vector<6x1xf32> to vector<6x512xf32>
    %93 = vector.broadcast %91 : vector<1x512xf32> to vector<6x512xf32>
    %94 = arith.mulf %92, %93 : vector<6x512xf32>
    %95 = vector.extract_strided_slice %20 {offsets = [1, 0], sizes = [1, 512], strides = [1, 1]} : vector<3x512xf32> to vector<1x512xf32>
    %96 = vector.broadcast %3 : vector<6x1xf32> to vector<6x512xf32>
    %97 = vector.broadcast %95 : vector<1x512xf32> to vector<6x512xf32>
    %98 = arith.mulf %96, %97 : vector<6x512xf32>
    %99 = arith.addf %94, %98 : vector<6x512xf32>
    %100 = vector.extract_strided_slice %20 {offsets = [2, 0], sizes = [1, 512], strides = [1, 1]} : vector<3x512xf32> to vector<1x512xf32>
    %101 = vector.broadcast %4 : vector<6x1xf32> to vector<6x512xf32>
    %102 = vector.broadcast %100 : vector<1x512xf32> to vector<6x512xf32>
    %103 = arith.mulf %101, %102 : vector<6x512xf32>
    %104 = arith.addf %99, %103 : vector<6x512xf32>
    %105 = vector.broadcast %5 : vector<6x1xf32> to vector<6x512xf32>
    %106 = arith.addf %104, %105 : vector<6x512xf32>
    %cst_39 = arith.constant 0.000000e+00 : f32
    %107 = vector.broadcast %cst_39 : f32 to vector<6x512xf32>
    %108 = arith.maximumf %106, %107 : vector<6x512xf32>
    %109 = vector.broadcast %0 : vector<1x512xf32> to vector<4x512xf32>
    %110 = arith.mulf %78, %109 : vector<4x512xf32>
    %111 = vector.broadcast %1 : vector<1x512xf32> to vector<4x512xf32>
    %112 = arith.mulf %82, %111 : vector<4x512xf32>
    %113 = arith.addf %110, %112 : vector<4x512xf32>
    %114 = arith.addf %113, %86 : vector<4x512xf32>
    %115 = math.sin %114 : vector<4x512xf32>
    %116 = vector.extract_strided_slice %108 {offsets = [0, 0], sizes = [1, 512], strides = [1, 1]} : vector<6x512xf32> to vector<1x512xf32>
    %117 = vector.broadcast %10 : vector<10x1xf32> to vector<10x512xf32>
    %118 = vector.broadcast %116 : vector<1x512xf32> to vector<10x512xf32>
    %119 = arith.mulf %117, %118 : vector<10x512xf32>
    %120 = vector.extract_strided_slice %108 {offsets = [1, 0], sizes = [1, 512], strides = [1, 1]} : vector<6x512xf32> to vector<1x512xf32>
    %121 = vector.broadcast %11 : vector<10x1xf32> to vector<10x512xf32>
    %122 = vector.broadcast %120 : vector<1x512xf32> to vector<10x512xf32>
    %123 = arith.mulf %121, %122 : vector<10x512xf32>
    %124 = vector.extract_strided_slice %108 {offsets = [2, 0], sizes = [1, 512], strides = [1, 1]} : vector<6x512xf32> to vector<1x512xf32>
    %125 = vector.broadcast %12 : vector<10x1xf32> to vector<10x512xf32>
    %126 = vector.broadcast %124 : vector<1x512xf32> to vector<10x512xf32>
    %127 = arith.mulf %125, %126 : vector<10x512xf32>
    %128 = vector.extract_strided_slice %108 {offsets = [3, 0], sizes = [1, 512], strides = [1, 1]} : vector<6x512xf32> to vector<1x512xf32>
    %129 = vector.broadcast %13 : vector<10x1xf32> to vector<10x512xf32>
    %130 = vector.broadcast %128 : vector<1x512xf32> to vector<10x512xf32>
    %131 = arith.mulf %129, %130 : vector<10x512xf32>
    %132 = vector.extract_strided_slice %108 {offsets = [4, 0], sizes = [1, 512], strides = [1, 1]} : vector<6x512xf32> to vector<1x512xf32>
    %133 = vector.broadcast %14 : vector<10x1xf32> to vector<10x512xf32>
    %134 = vector.broadcast %132 : vector<1x512xf32> to vector<10x512xf32>
    %135 = arith.mulf %133, %134 : vector<10x512xf32>
    %136 = vector.extract_strided_slice %108 {offsets = [5, 0], sizes = [1, 512], strides = [1, 1]} : vector<6x512xf32> to vector<1x512xf32>
    %137 = vector.broadcast %15 : vector<10x1xf32> to vector<10x512xf32>
    %138 = vector.broadcast %136 : vector<1x512xf32> to vector<10x512xf32>
    %139 = arith.mulf %137, %138 : vector<10x512xf32>
    %140 = vector.extract_strided_slice %115 {offsets = [0, 0], sizes = [1, 512], strides = [1, 1]} : vector<4x512xf32> to vector<1x512xf32>
    %141 = vector.broadcast %16 : vector<10x1xf32> to vector<10x512xf32>
    %142 = vector.broadcast %140 : vector<1x512xf32> to vector<10x512xf32>
    %143 = arith.mulf %141, %142 : vector<10x512xf32>
    %144 = vector.extract_strided_slice %115 {offsets = [1, 0], sizes = [1, 512], strides = [1, 1]} : vector<4x512xf32> to vector<1x512xf32>
    %145 = vector.broadcast %17 : vector<10x1xf32> to vector<10x512xf32>
    %146 = vector.broadcast %144 : vector<1x512xf32> to vector<10x512xf32>
    %147 = arith.mulf %145, %146 : vector<10x512xf32>
    %148 = vector.extract_strided_slice %115 {offsets = [2, 0], sizes = [1, 512], strides = [1, 1]} : vector<4x512xf32> to vector<1x512xf32>
    %149 = vector.broadcast %18 : vector<10x1xf32> to vector<10x512xf32>
    %150 = vector.broadcast %148 : vector<1x512xf32> to vector<10x512xf32>
    %151 = arith.mulf %149, %150 : vector<10x512xf32>
    %152 = vector.extract_strided_slice %115 {offsets = [3, 0], sizes = [1, 512], strides = [1, 1]} : vector<4x512xf32> to vector<1x512xf32>
    %153 = vector.broadcast %19 : vector<10x1xf32> to vector<10x512xf32>
    %154 = vector.broadcast %152 : vector<1x512xf32> to vector<10x512xf32>
    %155 = arith.mulf %153, %154 : vector<10x512xf32>
    %156 = arith.addf %90, %123 : vector<10x512xf32>
    %157 = arith.addf %119, %127 : vector<10x512xf32>
    %158 = arith.addf %156, %131 : vector<10x512xf32>
    %159 = arith.addf %157, %135 : vector<10x512xf32>
    %160 = arith.addf %158, %139 : vector<10x512xf32>
    %161 = arith.addf %159, %143 : vector<10x512xf32>
    %162 = arith.addf %160, %147 : vector<10x512xf32>
    %163 = arith.addf %161, %151 : vector<10x512xf32>
    %164 = arith.addf %162, %155 : vector<10x512xf32>
    %165 = arith.addf %164, %163 : vector<10x512xf32>
    %cst_40 = arith.constant 5.000000e-01 : f32
    %166 = vector.broadcast %cst_40 : f32 to vector<10x512xf32>
    %167 = arith.mulf %166, %165 : vector<10x512xf32>
    %168 = math.tanh %167 : vector<10x512xf32>
    %cst_41 = arith.constant 5.000000e-01 : f32
    %169 = vector.broadcast %cst_41 : f32 to vector<10x512xf32>
    %170 = arith.mulf %169, %168 : vector<10x512xf32>
    %cst_42 = arith.constant 5.000000e-01 : f32
    %171 = vector.broadcast %cst_42 : f32 to vector<10x512xf32>
    %172 = arith.addf %170, %171 : vector<10x512xf32>
    %173 = vector.extract_strided_slice %172 {offsets = [0, 0], sizes = [10, 256], strides = [1, 1]} : vector<10x512xf32> to vector<10x256xf32>
    %c0_43 = arith.constant 0 : index
    %c0_44 = arith.constant 0 : index
    %c0_45 = arith.constant 0 : index
    %174 = vector.load %arg2[%c0_43, %c0_44, %c0_45] : memref<2x10x256xf32, #tpu.memory_space<vmem>>, vector<1x10x256xf32>
    %175 = vector.shape_cast %174 : vector<1x10x256xf32> to vector<10x256xf32>
    %176 = vector.shape_cast %173 : vector<10x256xf32> to vector<1x10x256xf32>
    tpu.vector_store %arg2[%c0_43, %c0_44, %c0_45], %176 {strides = array<i32>} : memref<2x10x256xf32, #tpu.memory_space<vmem>>, vector<1x10x256xf32>,
    %177 = vector.extract_strided_slice %172 {offsets = [0, 256], sizes = [10, 256], strides = [1, 1]} : vector<10x512xf32> to vector<10x256xf32>
    %c1_46 = arith.constant 1 : index
    %c0_47 = arith.constant 0 : index
    %c0_48 = arith.constant 0 : index
    %178 = vector.load %arg2[%c1_46, %c0_47, %c0_48] : memref<2x10x256xf32, #tpu.memory_space<vmem>>, vector<1x10x256xf32>
    %179 = vector.shape_cast %178 : vector<1x10x256xf32> to vector<10x256xf32>
    %180 = vector.shape_cast %177 : vector<10x256xf32> to vector<1x10x256xf32>
    tpu.vector_store %arg2[%c1_46, %c0_47, %c0_48], %180 {strides = array<i32>} : memref<2x10x256xf32, #tpu.memory_space<vmem>>, vector<1x10x256xf32>,
    return
  }
}

</mosaic_0001>

<bundles_post_ra>
// kernel: svbrdf_forward.1
= control target key start
LH: loop header
LB: loop body
LE: loop exit
PB: predicated region body
PF: predicated region fallthrough
CT: control target
= control target key end

     0   :  { %7 = vsyncpa [#allocation3], 0  ;;  %s2209_s9 = smov [#allocation2]   ;;  %s4219_s0 = inlined_call_operand.vmem [shape: f32[3,512], index: 0, kind: input, shape index: {}]   ;;  %s4220_s1 = inlined_call_operand.hbm [shape: f32[48,512], index: 1, kind: input, shape index: {}]   ;;  %s4221_s2 = inlined_call_operand.vmem [shape: f32[2,10,256], index: 2, kind: output, shape index: {}]  }
   0x1   :  { %s15_s10 = sshll.u32 %s2209_s9, 4  ;;  %s2185_s13 = scalar_lea.hbm %s4220_s1, 3072  ;;  %s16_s10 = int_to_ptr.vmem [resolvable:$true] %s15_s10 }
   0x2   :  { %p2186_p0 = scmp.ne.s32.totalorder %s4220_s1, %s2185_s13  ;;  %p2189_p1 = scmp.lt.u32.totalorder %s2185_s13, %s4220_s1 }
   0x4   :  { %p2191_p2 = pnand %p2189_p1, %p2186_p0 }
   0x6   :  { %2194 = shalt.err (!%p2191_p2)
}
   0x7   :  { %s2195_s18 = scalar_lea.vmem %s16_s10, 3072  ;;  %p2200_p4 = scmp.lt.s32.totalorder %s16_s10, %s16_s10 }
   0x8   :  { %p2196_p3 = scmp.ne.s32.totalorder %s16_s10, %s2195_s18  ;;  %p2201_p5 = scmp.lt.s32.totalorder %s2195_s18, %s2195_s18 }
   0xa   :  { %p2202_p6 = por %p2201_p5, %p2200_p4 }
   0xc   :  { %p2203_p7 = pnand %p2202_p6, %p2196_p3 }
   0xe   :  { %2206 = shalt.err (!%p2203_p7)
}
   0xf   :  { %s2210_s19 = smov 512   ;;  %s2211_s20 = smov 32  }
  0x10   :  { %21 = dma.hbm_to_vmem [thread:$0]  %s4220_s1, 3072, %s16_s10, [#allocation3], %s2210_s19, %s2210_s19, %s2211_s20  }
  0x11   :  { %2207 = dma.done.wait [#allocation3], 3072  }
  0x12   :  { %2208 = vsyncadd [#allocation3], 4294964224  ;;  %vm43_vm0 = vcmask 1042432   ;;  %v2258_v0 = vld [vmem:[%s4219_s0] sm:$0x77]  ;;  %vm55_vm1 = vcmask 59392  }
  0x13   :  { %v2263_v1 = vld [vmem:[%s4219_s0 + $0x8] sm:$0x77]  ;;  %v41_v2 = vcombine.high %v2258_v0, %v2258_v0  ;;  %v44_v3 = vsel %vm43_vm0, %v2258_v0, 0.0  ;;  %v30_v10 = vld [vmem:[#allocation2 + $0x20] sm:$0x1c]  ;;  %vm73_vm2 = vcmask 64512  }
  0x14   :  { %v148_v4 = vcombine.high %v2263_v1, %v2263_v1  ;;  %v150_v6 = vsel %vm43_vm0, %v2263_v1, 0.0  ;;  %v52_v11 = vrot.slane %v30_v10, 2  ;;  %v31_v28 = vld [vmem:[#allocation2 + $0x25] ss:$0 sm:$0xff]  ;;  %v32_v36 = vld [vmem:[#allocation2 + $0x20] sm:$0xc0] }
  0x15   :  { %v45_v5 = vsel %vm43_vm0, %v41_v2, 0.0  ;;  %v33_v35 = vld [vmem:[#allocation2 + $0x40] sm:$0xff]  ;;  %vm69_vm3 = vcmask 64518   ;;  %vm80_vm4 = vcmask 60416   ;;  %v2212_v57 = vmov 8  }
  0x16   :  { %v151_v7 = vsel %vm43_vm0, %v148_v4, 0.0  ;;  %v46_v8 = vadd.f32 %v45_v5, %v44_v3  ;;  %v34_v38 = vld [vmem:[#allocation2 + $0x60] sm:$0xff]  ;;  %2106 = vset.pattern.permute.xlu0 %v2212_v57  ;;  %2105 = vset.pattern.permute.xlu1 %v2212_v57  ;;  %v2213_v3 = vmov 0   ;;  %v2214_v10 = vmov 1  }
  0x17   :  { %v152_v9 = vadd.f32 %v151_v7, %v150_v6  ;;  %v2273_v44 = vld [vmem:[#allocation2 + $0x80] sm:$0xf]  ;;  %v28_v2 = vld [vmem:[#allocation2] sm:$0xf0] }
  0x18   :  { %47 = vadd.xlane.f32.xlu0 %v46_v8  ;;  %v29_v6 = vld [vmem:[#allocation2 + $0x20] sm:$0x3] }
  0x1c   :  { %153 = vadd.xlane.f32.xlu0 %v152_v9 }
  0xa5   :  { %v48_v12 = vpop.xlane.xlu0 %47 }
  0xa6   :  { %v50_v13 = vmul.f32 0.00390625, %v48_v12  ;;  %v37_v12 = vld [vmem:[#allocation2 + $0xa0] sm:$0x3f] }
  0xa8   :  { %v54_v14 = vmul.f32 %v52_v11, %v50_v13  ;;  %v2215_v13 = vmov 2  }
  0xa9   :  { %v154_v15 = vpop.xlane.xlu0 %153 }
  0xaa   :  { %v56_v16 = vsel %vm55_vm1, %v54_v14, 0.0  ;;  %v155_v17 = vmul.f32 0.00390625, %v154_v15  ;;  %v36_v14 = vld [vmem:[#allocation2 + $0x80] sm:$0xf0]  ;;  %v2216_v15 = vmov 3  }
  0xab   :  { %v57_v18 = vrot.slane %v56_v16, 4 }
  0xac   :  { %v156_v19 = vmul.f32 %v155_v17, %v52_v11  ;;  %v2218_v17 = vmov 6  }
  0xad   :  { %v58_v20 = vadd.f32 %v57_v18, %v56_v16  ;;  %v2217_v16 = vmov 5  }
  0xae   :  { %v157_v21 = vsel %vm55_vm1, %v156_v19, 0.0 }
  0xaf   :  { %v59_v22 = vrot.slane %v58_v20, 2  ;;  %v158_v23 = vrot.slane %v157_v21, 4 }
  0xb1   :  { %v60_v24 = vadd.f32 %v59_v22, %v58_v20  ;;  %v159_v25 = vadd.f32 %v158_v23, %v157_v21  ;;  %v2219_v20 = vmov 4   ;;  %v2220_v21 = vmov 7  }
  0xb2   :  { %v101_v22 = vlaneseq }
  0xb3   :  { %v61_v26 = vrot.slane %v60_v24, 1  ;;  %v160_v27 = vrot.slane %v159_v25, 2 }
  0xb5   :  { %v62_v29 = vadd.f32 %v61_v26, %v60_v24  ;;  %v161_v30 = vadd.f32 %v160_v27, %v159_v25  ;;  %v2288_v24 = vshrl.u32 %v101_v22, 7  ;;  %v187_v25 = vld [vmem:[#allocation2 + $0x3] ss:$8 sm:$0xf]  ;;  %v4222_v27 = vmov 9  }
  0xb7   :  { %v63_v31 = vadd.f32 %v62_v29, %v31_v28  ;;  %v162_v32 = vrot.slane %v161_v30, 1  ;;  %4305 = vst [vmem:[#allocation5_spill] sm:$0xff] %v2288_v24  ;;  %v89_v29 = vld [vmem:[#allocation2 + $0x2] ss:$8 sm:$0xf] }
  0xb9   :  { %2129 = vtanh.f32 %v63_v31  ;;  %v163_v33 = vadd.f32 %v162_v32, %v161_v30 }
  0xbb   :  { %v164_v34 = vadd.f32 %v163_v33, %v31_v28  ;;  %v2292_v28 = vsub.s32 0, %v2288_v24 }
  0xbd   :  { %2131 = vtanh.f32 %v164_v34  ;;  %4306 = vst [vmem:[#allocation6_spill] sm:$0xff] %v2292_v28  ;;  %v2295_v30 = vrot.slane %v187_v25, %v2292_v28  ;;  %v2298_v31 = vrot.slane %v89_v29, %v2292_v28 }
  0xbf   :  { %4307 = vst [vmem:[#allocation7_spill] sm:$0xff] %v2295_v30  ;;  %4308 = vst [vmem:[#allocation8_spill] sm:$0xff] %v2298_v31 }
  0xc3   :  { %v2130_v37 = vpop.eup %2129 }
  0xc4   :  { %v66_v39 = vmul.f32 %v2130_v37, %v33_v35  ;;  %v65_v40 = vmul.f32 %v2130_v37, %v32_v36  ;;  %v67_v43 = vmul.f32 %v2130_v37, %v34_v38  ;;  %v68_v48 = vmul.f32 %v2130_v37, %v2273_v44 }
  0xc6   :  { %v74_v41 = vsel %vm73_vm2, %v66_v39, 0.0  ;;  %v70_v42 = vsel %vm69_vm3, %v65_v40, 0.0  ;;  %v77_v50 = vsel %vm73_vm2, %v67_v43, 0.0  ;;  %v81_v54 = vsel %vm80_vm4, %v68_v48, 0.0 }
  0xc7   :  { %v2132_v45 = vpop.eup %2131  ;;  %75 = vadd.xlane.f32.xlu1 %v74_v41  ;;  %71 = vadd.xlane.f32.xlu0 %v70_v42  ;;  %v25_v41 = vld [vmem:[#allocation2] ss:$8 sm:$0xf] }
  0xc8   :  { %v167_v46 = vmul.f32 %v2132_v45, %v33_v35  ;;  %v169_v47 = vmul.f32 %v2132_v45, %v2273_v44  ;;  %v166_v51 = vmul.f32 %v2132_v45, %v32_v36  ;;  %v168_v55 = vmul.f32 %v2132_v45, %v34_v38 }
  0xca   :  { %v173_v49 = vsel %vm73_vm2, %v167_v46, 0.0  ;;  %v179_v52 = vsel %vm80_vm4, %v169_v47, 0.0  ;;  %v170_v53 = vsel %vm69_vm3, %v166_v51, 0.0  ;;  %v176_v56 = vsel %vm73_vm2, %v168_v55, 0.0 }
  0xcb   :  { %174 = vadd.xlane.f32.xlu1 %v173_v49  ;;  %78 = vadd.xlane.f32.xlu0 %v77_v50  ;;  %v2320_v47 = vsub.s32 1, %v2288_v24 }
  0xcd   :  { %4309 = vst [vmem:[#allocation9_spill] sm:$0xff] %v2320_v47  ;;  %v2325_v49 = vrot.slane %v187_v25, %v2320_v47  ;;  %v2328_v50 = vrot.slane %v89_v29, %v2320_v47 }
  0xcf   :  { %171 = vadd.xlane.f32.xlu1 %v170_v53  ;;  %82 = vadd.xlane.f32.xlu0 %v81_v54  ;;  %4310 = vst [vmem:[#allocation10_spill] sm:$0xff] %v2325_v49  ;;  %4311 = vst [vmem:[#allocation11_spill] sm:$0xff] %v2328_v50 }
  0xd3   :  { %177 = vadd.xlane.f32.xlu1 %v176_v56 }
 0x154   :  { %v76_v58 = vpop.xlane.xlu1 %75  ;;  %v72_v59 = vpop.xlane.xlu0 %71 }
 0x155   :  { %v85_v60 = vadd.f32 %v76_v58, %v33_v35  ;;  %v84_v61 = vadd.f32 %v72_v59, %v32_v36 }
 0x157   :  { %97 = vperm.xlu0 %2106, %v85_v60   ;;  %92 = vperm.xlu1 %2105, %v84_v61   ;;  %v2344_v61 = vsub.s32 2, %v2288_v24 }
 0x158   :  { %v175_v62 = vpop.xlane.xlu1 %174  ;;  %v79_v7 = vpop.xlane.xlu0 %78 }
 0x159   :  { %v183_v63 = vadd.f32 %v175_v62, %v33_v35  ;;  %v86_v8 = vadd.f32 %v79_v7, %v34_v38  ;;  %v2301_v35 = vld [vmem:[#allocation2 + $0x1] ss:$8 sm:$0xf]  ;;  %4313 = vst [vmem:[#allocation13_spill] sm:$0xff] %v2344_v61  ;;  %v2360_v7 = vrot.slane %v89_v29, %v2344_v61 }
 0x15a   :  { %v492_v40 = vrot.slane %v2301_v35, %v2292_v28  ;;  %v496_v58 = vrot.slane %v2301_v35, %v2320_v47 }
 0x15b   :  { %2107 = vset.pattern.permute.xlu0 %v2213_v3  ;;  %195 = vperm.xlu1 %2105, %v183_v63   ;;  %v2350_v63 = vrot.slane %v25_v41, %v2320_v47  ;;  %4316 = vst [vmem:[#allocation16_spill] sm:$0xff] %v2360_v7 }
 0x15c   :  { %v172_v4 = vpop.xlane.xlu1 %171  ;;  %263 = vperm.xlu0 %2107, %v28_v2   ;;  %v83_v18 = vpop.xlane.xlu0 %82 }
 0x15d   :  { %v182_v5 = vadd.f32 %v172_v4, %v32_v36  ;;  %v87_v19 = vadd.f32 %v83_v18, %v2273_v44  ;;  %v2315_v44 = vrot.slane %v25_v41, %v2292_v28 }
 0x15f   :  { %190 = vperm.xlu1 %2105, %v182_v5  }
 0x160   :  { %268 = vperm.xlu0 %2107, %v29_v6   ;;  %v178_v9 = vpop.xlane.xlu1 %177 }
 0x161   :  { %v184_v11 = vadd.f32 %v178_v9, %v34_v38 }
 0x163   :  { %131 = vperm.xlu1 %2105, %v86_v8  }
 0x164   :  { %2109 = vset.pattern.permute.xlu0 %v2214_v10 }
 0x165   :  { %316 = vperm.xlu0 %2109, %v28_v2  }
 0x167   :  { %237 = vperm.xlu1 %2105, %v184_v11  }
 0x169   :  { %320 = vperm.xlu0 %2109, %v29_v6  }
 0x16b   :  { %2108 = vset.pattern.permute.xlu1 %v2215_v13 }
 0x16d   :  { %1412 = vperm.xlu0 %2109, %v37_v12  }
 0x171   :  { %2113 = vset.pattern.permute.xlu0 %v2215_v13 }
 0x172   :  { %1440 = vperm.xlu0 %2113, %v36_v14  }
 0x176   :  { %2114 = vset.pattern.permute.xlu0 %v2216_v15 }
 0x177   :  { %436 = vperm.xlu0 %2114, %v28_v2  }
 0x17b   :  { %1476 = vperm.xlu0 %2114, %v37_v12  }
 0x17f   :  { %2118 = vset.pattern.permute.xlu0 %v2217_v16 }
 0x180   :  { %1536 = vperm.xlu0 %2118, %v36_v14  }
 0x184   :  { %2121 = vset.pattern.permute.xlu0 %v2218_v17 }
 0x185   :  { %1572 = vperm.xlu0 %2121, %v37_v12  }
 0x189   :  { %2123 = vset.pattern.permute.xlu0 %v2212_v57 }
 0x18a   :  { %1632 = vperm.xlu0 %2123, %v36_v14  }
 0x18b   :  { %180 = vadd.xlane.f32.xlu1 %v179_v52 }
 0x18e   :  { %140 = vperm.xlu0 %2123, %v87_v19   ;;  %v500_v19 = vrot.slane %v2301_v35, %v2344_v61 }
 0x19c   :  { %376 = vperm.xlu1 %2108, %v28_v2   ;;  %v115_v2 = vsub.s32 3, %v2288_v24 }
 0x19e   :  { %v2363_v9 = vrot.slane %v89_v29, %v115_v2 }
 0x1a0   :  { %380 = vperm.xlu1 %2108, %v29_v6   ;;  %4317 = vst [vmem:[#allocation17_spill] sm:$0xff] %v2363_v9 }
 0x1a4   :  { %2110 = vset.pattern.permute.xlu1 %v2216_v15 }
 0x1a5   :  { %440 = vperm.xlu1 %2110, %v29_v6   ;;  %v2357_v6 = vrot.slane %v187_v25, %v115_v2 }
 0x1a7   :  { %4315 = vst [vmem:[#allocation15_spill] sm:$0xff] %v2357_v6 }
 0x1a9   :  { %2111 = vset.pattern.permute.xlu1 %v2214_v10 }
 0x1aa   :  { %1408 = vperm.xlu1 %2111, %v36_v14  }
 0x1ae   :  { %2112 = vset.pattern.permute.xlu1 %v2213_v3  ;;  %v2354_v3 = vrot.slane %v187_v25, %v2344_v61 }
 0x1af   :  { %1375 = vperm.xlu1 %2112, %v36_v14  }
 0x1b0   :  { %4314 = vst [vmem:[#allocation14_spill] sm:$0xff] %v2354_v3 }
 0x1b3   :  { %1380 = vperm.xlu1 %2112, %v37_v12  }
 0x1b7   :  { %2115 = vset.pattern.permute.xlu1 %v2215_v13 }
 0x1b8   :  { %1444 = vperm.xlu1 %2115, %v37_v12  }
 0x1bc   :  { %2116 = vset.pattern.permute.xlu1 %v2216_v15 }
 0x1bd   :  { %1472 = vperm.xlu1 %2116, %v36_v14  }
 0x1c1   :  { %2117 = vset.pattern.permute.xlu1 %v2219_v20 }
 0x1c2   :  { %1504 = vperm.xlu1 %2117, %v36_v14  }
 0x1c6   :  { %1508 = vperm.xlu1 %2117, %v37_v12  }
 0x1ca   :  { %2119 = vset.pattern.permute.xlu1 %v2217_v16  ;;  %v2372_v16 = vsub.s32 4, %v2288_v24 }
 0x1cb   :  { %1540 = vperm.xlu1 %2119, %v37_v12  }
 0x1cc   :  { %4318 = vst [vmem:[#allocation18_spill] sm:$0xff] %v2372_v16 }
 0x1cf   :  { %2120 = vset.pattern.permute.xlu1 %v2218_v17 }
 0x1d0   :  { %1568 = vperm.xlu1 %2120, %v36_v14  }
 0x1d4   :  { %2122 = vset.pattern.permute.xlu1 %v2220_v21 }
 0x1d5   :  { %1600 = vperm.xlu1 %2122, %v36_v14  }
 0x1d6   :  { %v2285_v23 = vpop.permute.xlu1 %92  ;;  %v98_v32 = vpop.permute.xlu0 %97 }
 0x1d7   :  { %v125_v36 = vmul.f32 %v2298_v31, %v98_v32  ;;  %v121_v38 = vmul.f32 %v2298_v31, %v2285_v23  ;;  %v126_v53 = vmul.f32 %v2328_v50, %v98_v32  ;;  %v122_v56 = vmul.f32 %v2328_v50, %v2285_v23 }
 0x1d8   :  { %v128_v18 = vmul.f32 %v2363_v9, %v98_v32  ;;  %v123_v21 = vmul.f32 %v2360_v7, %v2285_v23 }
 0x1d9   :  { %1604 = vperm.xlu1 %2122, %v37_v12  }
 0x1da   :  { %v196_v26 = vpop.permute.xlu1 %195 }
 0x1db   :  { %v223_v34 = vmul.f32 %v2295_v30, %v196_v26  ;;  %v224_v52 = vmul.f32 %v2325_v49, %v196_v26  ;;  %v225_v10 = vmul.f32 %v2354_v3, %v196_v26  ;;  %v226_v13 = vmul.f32 %v2357_v6, %v196_v26 }
 0x1dc   :  { %v124_v26 = vmul.f32 %v2363_v9, %v2285_v23  ;;  %v286_v23 = vrot.slane %v2263_v1, %v2372_v16 }
 0x1dd   :  { %2124 = vset.pattern.permute.xlu1 %v2212_v57  ;;  %v2307_v39 = vadd.f32 %v223_v34, %v125_v36  ;;  %v2339_v57 = vadd.f32 %v224_v52, %v126_v53  ;;  %v2387_v29 = vadd.f32 %v226_v13, %v128_v18  ;;  %v274_v34 = vrot.slane %v2258_v0, %v2292_v28 }
 0x1de   :  { %1636 = vperm.xlu1 %2124, %v37_v12   ;;  %v191_v33 = vpop.permute.xlu1 %190  ;;  %v278_v36 = vrot.slane %v2258_v0, %v2372_v16  ;;  %v4348_v16 = vmov 2475754826  }
 0x1df   :  { %v219_v37 = vmul.f32 %v2295_v30, %v191_v33  ;;  %v2312_v43 = vmul.f32 %v492_v40, %v2307_v39  ;;  %v220_v54 = vmul.f32 %v2325_v49, %v191_v33  ;;  %v2347_v62 = vmul.f32 %v496_v58, %v2339_v57 }
 0x1e0   :  { %v221_v15 = vmul.f32 %v2354_v3, %v191_v33  ;;  %v222_v20 = vmul.f32 %v2357_v6, %v191_v33  ;;  %v2397_v40 = vrot.slane %v25_v41, %v2344_v61  ;;  %v2415_v58 = vrot.slane %v278_v36, %v2292_v28 }
 0x1e1   :  { %v227_v42 = vadd.f32 %v219_v37, %v121_v38  ;;  %v517_v46 = vrot.slane %v2312_v43, 4  ;;  %v228_v59 = vadd.f32 %v220_v54, %v122_v56  ;;  %v4227_v8 = vrot.slane %v2347_v62, 4 }
 0x1e2   :  { %2125 = vset.pattern.permute.xlu1 %v4222_v27  ;;  %v132_v17 = vpop.permute.xlu1 %131  ;;  %v229_v33 = vadd.f32 %v221_v15, %v123_v21  ;;  %v282_v37 = vrot.slane %v2263_v1, %v2292_v28  ;;  %v230_v38 = vadd.f32 %v222_v20, %v124_v26  ;;  %v2411_v54 = vrot.slane %v274_v34, %v2292_v28 }
 0x1e3   :  { %1664 = vperm.xlu1 %2125, %v36_v14   ;;  %v480_v45 = vmul.f32 %v2315_v44, %v227_v42  ;;  %v481_v4 = vmul.f32 %v2350_v63, %v228_v59  ;;  %v127_v14 = vmul.f32 %v2360_v7, %v98_v32  ;;  %v504_v32 = vrot.slane %v2301_v35, %v115_v2 }
 0x1e4   :  { %v2418_v59 = vrot.slane %v282_v37, %v2292_v28  ;;  %v134_v13 = vmul.f32 %v132_v17, %v2298_v31  ;;  %v4223_v43 = vmov 1326507024   ;;  %v4230_v27 = vmov 2102212464  }
 0x1e5   :  { %v525_v48 = vadd.f32 %v517_v46, %v480_v45  ;;  %v526_v11 = vadd.f32 %v4227_v8, %v481_v4  ;;  %v2380_v22 = vadd.f32 %v225_v10, %v127_v14  ;;  %v2404_v45 = vrot.slane %v25_v41, %v115_v2 }
 0x1e6   :  { %v238_v52 = vpop.permute.xlu1 %237  ;;  %v2408_v53 = vmul.f32 %v504_v32, %v2387_v29  ;;  %v326_v10 = vrot.slane %v2258_v0, %v2320_v47  ;;  %v484_v32 = vmul.f32 %v2315_v44, %v2307_v39 }
 0x1e7   :  { %v2331_v51 = vadd.f32 %v525_v48, %v2307_v39  ;;  %v2383_v25 = vadd.f32 %v526_v11, %v2339_v57  ;;  %v2402_v35 = vmul.f32 %v500_v19, %v2380_v22  ;;  %v483_v41 = vmul.f32 %v2404_v45, %v230_v38 }
 0x1e8   :  { %v240_v2 = vmul.f32 %v238_v52, %v2295_v30  ;;  %v2429_v11 = vsub.s32 5, %v2288_v24  ;;  %v2440_v19 = vsub.s32 6, %v2288_v24  ;;  %v241_v21 = vmul.f32 %v238_v52, %v2325_v49 }
 0x1e9   :  { %4312 = vst [vmem:[#allocation12_spill] sm:$0xff] %v2331_v51  ;;  %v544_v55 = vand.u32 2139095040, %v2331_v51  ;;  %4319 = vst [vmem:[#allocation19_spill] sm:$0xff] %v2383_v25  ;;  %v648_v48 = vand.u32 2139095040, %v2383_v25  ;;  %v4226_v4 = vrot.slane %v2402_v35, 4  ;;  %v2454_v37 = vrot.slane %v326_v10, %v2320_v47 }
 0x1ea   :  { %4320 = vst [vmem:[#allocation20_spill] sm:$0xff] %v2429_v11  ;;  %4321 = vst [vmem:[#allocation21_spill] sm:$0xff] %v2440_v19  ;;  %v2445_v26 = vadd.f32 %v240_v2, %v134_v13  ;;  %v135_v38 = vmul.f32 %v132_v17, %v2328_v50  ;;  %v242_v44 = vmul.f32 %v238_v52, %v2354_v3  ;;  %v4232_v2 = vmov 920167782  }
 0x1eb   :  { %v545_v60 = vshrl.u32 %v544_v55, 23  ;;  %v482_v55 = vmul.f32 %v2397_v40, %v229_v33  ;;  %4323 = vst [vmem:[#allocation23_spill] sm:$0xff] %v2454_v37  ;;  %v4238_v33 = vmov 2475754826  }
 0x1ec   :  { %4322 = vst [vmem:[#allocation22_spill] sm:$0xff] %v2445_v26  ;;  %v2471_v13 = vadd.f32 %v241_v21, %v135_v38  ;;  %v4236_v21 = vmov 2131351028  }
 0x1ed   :  { %v2018_v5 = vadd.s32 4294967169, %v545_v60  ;;  %v2422_v60 = vrot.slane %v286_v23, %v2292_v28  ;;  %v527_v14 = vadd.f32 %v4226_v4, %v482_v55  ;;  %v136_v23 = vmul.f32 %v132_v17, %v2360_v7 }
 0x1ee   :  { %v529_v55 = vadd.f32 %v517_v46, %v484_v32  ;;  %4326 = vst [vmem:[#allocation26_spill] sm:$0xff] %v2471_v13  ;;  %v4242_v4 = vmov 683565275  }
 0x1ef   :  { %v551_v12 = vadd.s32 1, %v2018_v5  ;;  %v649_v5 = vshrl.u32 %v648_v48, 23  ;;  %v137_v48 = vmul.f32 %v132_v17, %v2363_v9  ;;  %v2462_v39 = vadd.f32 %v527_v14, %v2380_v22 }
 0x1f0   :  { %v2474_v17 = vadd.f32 %v529_v55, %v2445_v26  ;;  %v4350_v26 = vmov 683565275  }
 0x1f1   :  { %vm552_vm5 = vcmp.gt.s32.totalorder %v551_v12, 0  ;;  %v2022_v34 = vadd.s32 4294967169, %v649_v5  ;;  %4324 = vst [vmem:[#allocation24_spill] sm:$0xff] %v2462_v39 }
 0x1f2   :  { %v553_v42 = vsel %vm552_vm5, %v551_v12, 0  ;;  %v4225_v12 = vrot.slane %v2408_v53, 4  ;;  %v960_v49 = vand.u32 2139095040, %v2474_v17 }
 0x1f3   :  { %v555_v56 = vand.u32 31, %v553_v42  ;;  %v2478_v14 = vshrl.u32 %v553_v42, 5  ;;  %v655_v32 = vadd.s32 1, %v2022_v34  ;;  %v752_v34 = vand.u32 2139095040, %v2462_v39 }
 0x1f4   :  { %v528_v20 = vadd.f32 %v4225_v12, %v483_v41  ;;  %v243_v41 = vmul.f32 %v238_v52, %v2357_v6  ;;  %v485_v12 = vmul.f32 %v2350_v63, %v2339_v57 }
 0x1f5   :  { %v2435_v15 = vsub.s32 32, %v555_v56  ;;  %v567_v36 = vshll.u32 %v4230_v27, %v555_v56  ;;  %v570_v42 = vshll.u32 %v4232_v2, %v555_v56  ;;  %v558_v52 = vshll.u32 %v4242_v4, %v555_v56 }
 0x1f6   :  { %v2469_v10 = vadd.f32 %v528_v20, %v2387_v29  ;;  %v561_v8 = vshll.u32 %v4238_v33, %v555_v56  ;;  %v564_v6 = vshll.u32 %v4236_v21, %v555_v56  ;;  %vm656_vm6 = vcmp.gt.s32.totalorder %v655_v32, 0 }
 0x1f7   :  { %v568_v5 = vshrl.u32 %v4232_v2, %v2435_v15  ;;  %v571_v46 = vshrl.u32 %v4223_v43, %v2435_v15  ;;  %v559_v20 = vshrl.u32 %v4238_v33, %v2435_v15  ;;  %v562_v38 = vshrl.u32 %v4236_v21, %v2435_v15 }
 0x1f8   :  { %4325 = vst [vmem:[#allocation25_spill] sm:$0xff] %v2469_v10  ;;  %v565_v55 = vshrl.u32 %v4230_v27, %v2435_v15  ;;  %v2490_v43 = vadd.f32 %v242_v44, %v136_v23  ;;  %v4328_v27 = vrot.slane %v2347_v62, 4  ;;  %v4329_v23 = vand.u32 2147483647, %v2331_v51 }
 0x1f9   :  { %v569_v18 = vor.u32 %v568_v5, %v567_v36  ;;  %v572_v3 = vor.u32 %v571_v46, %v570_v42  ;;  %v2502_v30 = vor.u32 %v559_v20, %v558_v52  ;;  %v2504_v57 = vor.u32 %v562_v38, %v561_v8 }
 0x1fa   :  { %4327 = vst [vmem:[#allocation27_spill] sm:$0xff] %v2490_v43  ;;  %v530_v2 = vadd.f32 %v4328_v27, %v485_v12  ;;  %v548_v44 = vand.u32 8388607, %v4329_v23  ;;  %v566_v63 = vor.u32 %v565_v55, %v564_v6  ;;  %vm576_vm7 = vcmp.lt.s32.totalorder %v2478_v14, 4 }
 0x1fb   :  { %v753_v36 = vshrl.u32 %v752_v34, 23  ;;  %v856_v56 = vand.u32 2139095040, %v2469_v10  ;;  %v2508_v5 = vadd.f32 %v243_v41, %v137_v48  ;;  %v582_v27 = vsel %vm576_vm7, %v569_v18, 920167782 }
 0x1fc   :  { %v486_v62 = vmul.f32 %v2397_v40, %v2380_v22  ;;  %v487_v12 = vmul.f32 %v2404_v45, %v2387_v29  ;;  %v2517_v8 = vadd.f32 %v530_v2, %v2471_v13  ;;  %v586_v6 = vsel %vm576_vm7, %v572_v3, 1326507024  ;;  %v264_v2 = vpop.permute.xlu0 %263 }
 0x1fd   :  { %4330 = vst [vmem:[#allocation28_spill] sm:$0xff] %v2508_v5  ;;  %v657_v46 = vsel %vm656_vm6, %v655_v32, 0  ;;  %v961_v52 = vshrl.u32 %v960_v49, 23  ;;  %vm573_vm8 = vcmp.lt.s32.totalorder %v2478_v14, 1  ;;  %vm575_vm9 = vcmp.lt.s32.totalorder %v2478_v14, 3 }
 0x1fe   :  { %v4331_v48 = vrot.slane %v2402_v35, 4  ;;  %v549_v22 = vor.u32 8388608, %v548_v44  ;;  %v581_v29 = vsel %vm573_vm8, %v2502_v30, %v2504_v57  ;;  %v583_v40 = vsel %vm575_vm9, %v566_v63, %v582_v27 }
 0x1ff   :  { %v2026_v3 = vadd.s32 4294967169, %v753_v36  ;;  %v857_v45 = vshrl.u32 %v856_v56, 23  ;;  %v585_v49 = vsel %vm573_vm8, %v2504_v57, %v566_v63  ;;  %v587_v35 = vsel %vm575_vm9, %v569_v18, %v586_v6 }
 0x200   :  { %v531_v41 = vadd.f32 %v4331_v48, %v486_v62  ;;  %v659_v32 = vand.u32 31, %v657_v46  ;;  %v4332_v38 = vrot.slane %v2263_v1, %v2320_v47  ;;  %vm574_vm10 = vcmp.lt.s32.totalorder %v2478_v14, 2 }
 0x201   :  { %v4334_v42 = vrot.slane %v2408_v53, 4  ;;  %v2034_v23 = vadd.s32 4294967169, %v961_v52  ;;  %v1064_v44 = vand.u32 2139095040, %v2517_v8  ;;  %v584_v18 = vsel %vm574_vm10, %v581_v29, %v583_v40 }
 0x202   :  { %v2538_v20 = vadd.f32 %v531_v41, %v2490_v43  ;;  %v2544_v55 = vrot.slane %v4332_v38, %v2320_v47  ;;  %v4335_v36 = vrot.slane %v2258_v0, %v2429_v11  ;;  %v4337_v27 = vrot.slane %v2263_v1, %v2429_v11 }
 0x203   :  { %v532_v34 = vadd.f32 %v4334_v42, %v487_v12  ;;  %v588_v53 = vsel %vm574_vm10, %v585_v49, %v587_v35  ;;  %v2566_v12 = vshll.u32 %v549_v22, 8  ;;  %v759_v6 = vadd.s32 1, %v2026_v3  ;;  %v2582_v49 = vpop.permute.xlu0 %268 }
 0x204   :  { %4333 = vst [vmem:[#allocation29_spill] sm:$0xff] %v2544_v55  ;;  %v2556_v56 = vrot.slane %v4335_v36, %v2320_v47  ;;  %v2562_v62 = vrot.slane %v4337_v27, %v2320_v47  ;;  %v2030_v52 = vadd.s32 4294967169, %v857_v45  ;;  %v2569_v48 = vmul.f32 %v2411_v54, %v264_v2 }
 0x205   :  { %v2572_v0 = vadd.f32 %v532_v34, %v2508_v5  ;;  %v2574_v41 = vsub.s32 32, %v659_v32  ;;  %v1168_v29 = vand.u32 2139095040, %v2538_v20  ;;  %v967_v22 = vadd.s32 1, %v2034_v23 }
 0x206   :  { %4336 = vst [vmem:[#allocation30_spill] sm:$0xff] %v2556_v56  ;;  %v2578_v1 = vmul.u32.u64.low %v2566_v12, %v584_v18  ;;  %v2579_v40 = vmul.u32.u64.high %v2566_v12, %v584_v18, %v2578_v1  ;;  %v1065_v3 = vshrl.u32 %v1064_v44, 23  ;;  %v2589_v38 = vmul.f32 %v2415_v58, %v264_v2 }
 0x207   :  { %4338 = vst [vmem:[#allocation31_spill] sm:$0xff] %v2572_v0  ;;  %v2585_v45 = vmul.u32.u64.low %v2566_v12, %v588_v53  ;;  %v2586_v35 = vmul.u32.u64.high %v2566_v12, %v588_v53, %v2585_v45  ;;  %v2592_v42 = vmul.f32 %v2418_v59, %v264_v2  ;;  %v2595_v34 = vmul.f32 %v2422_v60, %v264_v2 }
 0x208   :  { %4339 = vst [vmem:[#allocation32_spill] sm:$0xff] %v2578_v1  ;;  %4340 = vst [vmem:[#allocation33_spill] sm:$0xff] %v2589_v38  ;;  %v2599_v18 = vmul.f32 %v2411_v54, %v2582_v49  ;;  %v863_v36 = vadd.s32 1, %v2030_v52  ;;  %v2603_v23 = vmul.f32 %v2415_v58, %v2582_v49  ;;  %v1272_v44 = vand.u32 2139095040, %v2572_v0 }
 0x209   :  { %4341 = vst [vmem:[#allocation34_spill] sm:$0xff] %v2592_v42  ;;  %4342 = vst [vmem:[#allocation35_spill] sm:$0xff] %v2595_v34  ;;  %v578_v27 = vsel %vm576_vm7, %v566_v63, 2102212464  ;;  %v2608_v53 = vshrl.u32 %v657_v46, 5  ;;  %vm760_vm11 = vcmp.gt.s32.totalorder %v759_v6, 0  ;;  %v557_v2 = vshrl.u32 %v4242_v4, %v2435_v15 }
 0x20a   :  { %4343 = vst [vmem:[#allocation36_spill] sm:$0xff] %v2599_v18  ;;  %4344 = vst [vmem:[#allocation37_spill] sm:$0xff] %v2603_v23  ;;  %v4345_v45 = vmov 920167782   ;;  %vm968_vm12 = vcmp.gt.s32.totalorder %v967_v22, 0  ;;  %v2038_v52 = vadd.s32 4294967169, %v1065_v3  ;;  %v579_v63 = vsel %vm575_vm9, %v2504_v57, %v578_v27 }
 0x20b   :  { %v672_v54 = vshrl.u32 %v4345_v45, %v2574_v41  ;;  %v1169_v21 = vshrl.u32 %v1168_v29, 23  ;;  %v4346_v58 = vmov 1326507024   ;;  %v577_v47 = vsel %vm573_vm8, %v557_v2, %v2502_v30 }
 0x20c   :  { %v675_v33 = vshrl.u32 %v4346_v58, %v2574_v41  ;;  %v4347_v15 = vmov 2102212464   ;;  %v663_v5 = vshrl.u32 %v4348_v16, %v2574_v41  ;;  %v4349_v29 = vmov 2131351028  }
 0x20d   :  { %v671_v4 = vshll.u32 %v4347_v15, %v659_v32  ;;  %v666_v3 = vshrl.u32 %v4349_v29, %v2574_v41  ;;  %v669_v43 = vshrl.u32 %v4347_v15, %v2574_v41  ;;  %v674_v13 = vshll.u32 %v4345_v45, %v659_v32 }
 0x20e   :  { %v969_v30 = vsel %vm968_vm12, %v967_v22, 0  ;;  %v599_v2 = vadd.s32 1, %v2579_v40  ;;  %v662_v57 = vshll.u32 %v4350_v26, %v659_v32  ;;  %vm598_vm13 = vc.u32 %v2586_v35, %v2578_v1 }
 0x20f   :  { %v673_v27 = vor.u32 %v672_v54, %v671_v4  ;;  %v665_v46 = vshll.u32 %v4348_v16, %v659_v32  ;;  %v668_v24 = vshll.u32 %v4349_v29, %v659_v32  ;;  %v676_v9 = vor.u32 %v675_v33, %v674_v13 }
 0x210   :  { %vm864_vm14 = vcmp.gt.s32.totalorder %v863_v36, 0  ;;  %v1273_v7 = vshrl.u32 %v1272_v44, 23  ;;  %v580_v50 = vsel %vm574_vm10, %v577_v47, %v579_v63  ;;  %v4351_v22 = vand.u32 2147483647, %v2383_v25 }
 0x211   :  { %v664_v11 = vor.u32 %v663_v5, %v662_v57  ;;  %v667_v28 = vor.u32 %v666_v3, %v665_v46  ;;  %v670_v61 = vor.u32 %v669_v43, %v668_v24  ;;  %vm680_vm15 = vcmp.lt.s32.totalorder %v2608_v53, 4 }
 0x212   :  { %v652_v31 = vand.u32 8388607, %v4351_v22  ;;  %v2642_v4 = vand.u32 31, %v969_v30  ;;  %v2042_v54 = vadd.s32 4294967169, %v1169_v21  ;;  %v600_v19 = vsel %vm598_vm13, %v599_v2, %v2579_v40 }
 0x213   :  { %v686_v33 = vsel %vm680_vm15, %v673_v27, 920167782  ;;  %v761_v13 = vsel %vm760_vm11, %v759_v6, 0  ;;  %v1071_v14 = vadd.s32 1, %v2038_v52  ;;  %v596_v47 = vmul.u32 %v2566_v12, %v580_v50 }
 0x214   :  { %v690_v5 = vsel %vm680_vm15, %v676_v9, 1326507024  ;;  %v865_v24 = vsel %vm864_vm14, %v863_v36, 0  ;;  %v2046_v43 = vadd.s32 4294967169, %v1273_v7  ;;  %vm677_vm0 = vcmp.lt.s32.totalorder %v2608_v53, 1 }
 0x215   :  { %vm679_vm1 = vcmp.lt.s32.totalorder %v2608_v53, 3  ;;  %v2654_v21 = vadd.s32 %v600_v19, %v596_v47  ;;  %v653_v32 = vor.u32 8388608, %v652_v31  ;;  %v685_v40 = vsel %vm677_vm0, %v664_v11, %v667_v28 }
 0x216   :  { %v687_v6 = vsel %vm679_vm1, %v670_v61, %v686_v33  ;;  %v2661_v50 = vsub.s32 32, %v2642_v4  ;;  %v1175_v9 = vadd.s32 1, %v2042_v54  ;;  %v689_v7 = vsel %vm677_vm0, %v667_v28, %v670_v61 }
 0x217   :  { %v691_v12 = vsel %vm679_vm1, %v673_v27, %v690_v5  ;;  %v2669_v19 = vmul.f32 %v2418_v59, %v2582_v49  ;;  %v2673_v31 = vmul.f32 %v2422_v60, %v2582_v49  ;;  %vm1072_vm2 = vcmp.gt.s32.totalorder %v1071_v14, 0 }
 0x218   :  { %vm678_vm3 = vcmp.lt.s32.totalorder %v2608_v53, 2  ;;  %v2676_v36 = vshrl.u32 %v761_v13, 5  ;;  %v2678_v44 = vand.u32 31, %v761_v13  ;;  %v2680_v52 = vshrl.u32 %v865_v24, 5 }
 0x219   :  { %4352 = vst [vmem:[#allocation38_spill] sm:$0xff] %v2669_v19  ;;  %4353 = vst [vmem:[#allocation39_spill] sm:$0xff] %v2673_v31  ;;  %v688_v63 = vsel %vm678_vm3, %v685_v40, %v687_v6  ;;  %v1279_v46 = vadd.s32 1, %v2046_v43  ;;  %v602_v59 = vadd.s32 536870912, %v2654_v21  ;;  %v692_v3 = vsel %vm678_vm3, %v689_v7, %v691_v12  ;;  %v2720_v6 = vpop.permute.xlu0 %316 }
 0x21a   :  { %v2687_v60 = vshll.u32 %v653_v32, 8  ;;  %v2689_v49 = vand.u32 31, %v865_v24  ;;  %v984_v2 = vshrl.u32 %v4345_v45, %v2661_v50  ;;  %v1073_v57 = vsel %vm1072_vm2, %v1071_v14, 0 }
 0x21b   :  { %vm1176_vm4 = vcmp.gt.s32.totalorder %v1175_v9, 0  ;;  %v987_v27 = vshrl.u32 %v4346_v58, %v2661_v50  ;;  %v682_v22 = vsel %vm680_vm15, %v670_v61, 2102212464  ;;  %v983_v13 = vshll.u32 %v4347_v15, %v2642_v4 }
 0x21c   :  { %v2698_v54 = vmul.u32.u64.low %v2687_v60, %v688_v63  ;;  %v2699_v33 = vmul.u32.u64.high %v2687_v60, %v688_v63, %v2698_v54  ;;  %v661_v47 = vshrl.u32 %v4350_v26, %v2574_v41  ;;  %v2710_v24 = vshrl.u32 %v969_v30, 5 }
 0x21d   :  { %v2707_v14 = vmul.u32.u64.low %v2687_v60, %v692_v3  ;;  %v2708_v5 = vmul.u32.u64.high %v2687_v60, %v692_v3, %v2707_v14  ;;  %v986_v61 = vshll.u32 %v4345_v45, %v2642_v4  ;;  %vm1280_vm5 = vcmp.gt.s32.totalorder %v1279_v46, 0 }
 0x21e   :  { %4354 = vst [vmem:[#allocation40_spill] sm:$0xff] %v2698_v54  ;;  %v2714_v43 = vshrl.u32 %v602_v59, 30  ;;  %v2716_v32 = vor.u32 %v984_v2, %v983_v13  ;;  %v2718_v40 = vand.u32 31, %v1073_v57  ;;  %v681_v41 = vsel %vm677_vm0, %v661_v47, %v664_v11 }
 0x21f   :  { %4355 = vst [vmem:[#allocation41_spill] sm:$0xff] %v2708_v5  ;;  %v683_v7 = vsel %vm679_vm1, %v667_v28, %v682_v22  ;;  %v2727_v30 = vsub.s32 32, %v2678_v44  ;;  %v2730_v12 = vsub.s32 32, %v2689_v49  ;;  %v988_v63 = vor.u32 %v987_v27, %v986_v61 }
 0x220   :  { %4356 = vst [vmem:[#allocation42_spill] sm:$0xff] %v2714_v43  ;;  %v2734_v59 = vmul.f32 %v2454_v37, %v2720_v6  ;;  %v2736_v3 = vshrl.u32 %v1073_v57, 5  ;;  %v2739_v2 = vsel %vm1176_vm4, %v1175_v9, 0  ;;  %v2743_v11 = vmul.f32 %v2556_v56, %v2720_v6 }
 0x221   :  { %v2747_v28 = vmul.f32 %v2544_v55, %v2720_v6  ;;  %vm992_vm6 = vcmp.lt.s32.totalorder %v2710_v24, 4  ;;  %v2751_v27 = vsel %vm1280_vm5, %v1279_v46, 0  ;;  %v604_v22 = vshll.u32 %v2714_v43, 30 }
 0x222   :  { %4357 = vst [vmem:[#allocation43_spill] sm:$0xff] %v2743_v11  ;;  %v2756_v57 = vsel %vm678_vm3, %v681_v41, %v683_v7  ;;  %v2761_v9 = vsel %vm992_vm6, %v2716_v32, 920167782  ;;  %v2764_v13 = vsub.s32 32, %v2718_v40  ;;  %v2768_v47 = vshll.u32 %v4347_v15, %v2718_v40 }
 0x223   :  { %4358 = vst [vmem:[#allocation44_spill] sm:$0xff] %v2747_v28  ;;  %v2772_v46 = vshll.u32 %v4345_v45, %v2718_v40  ;;  %v2776_v53 = vsel %vm992_vm6, %v988_v63, 1326507024  ;;  %v2779_v14 = vshrl.u32 %v2739_v2, 5  ;;  %v703_v61 = vadd.s32 1, %v2699_v33 }
 0x224   :  { %v700_v7 = vmul.u32 %v2687_v60, %v2756_v57  ;;  %vm702_vm7 = vc.u32 %v2708_v5, %v2698_v54  ;;  %v776_v31 = vshrl.u32 %v4345_v45, %v2727_v30  ;;  %v779_v63 = vshrl.u32 %v4346_v58, %v2727_v30 }
 0x225   :  { %v2792_v19 = vsub.s32 %v2654_v21, %v604_v22  ;;  %v766_v23 = vshll.u32 %v4350_v26, %v2678_v44  ;;  %v767_v41 = vshrl.u32 %v4348_v16, %v2727_v30  ;;  %v770_v60 = vshrl.u32 %v4349_v29, %v2727_v30 }
 0x226   :  { %v773_v57 = vshrl.u32 %v4347_v15, %v2727_v30  ;;  %v775_v18 = vshll.u32 %v4347_v15, %v2678_v44  ;;  %v778_v55 = vshll.u32 %v4345_v45, %v2678_v44  ;;  %v880_v21 = vshrl.u32 %v4345_v45, %v2730_v12 }
 0x227   :  { %v704_v22 = vsel %vm702_vm7, %v703_v61, %v2699_v33  ;;  %v4359_v56 = vand.u32 2147483647, %v2462_v39  ;;  %v769_v34 = vshll.u32 %v4348_v16, %v2678_v44  ;;  %v772_v28 = vshll.u32 %v4349_v29, %v2678_v44 }
 0x228   :  { %v777_v42 = vor.u32 %v776_v31, %v775_v18  ;;  %v780_v25 = vor.u32 %v779_v63, %v778_v55  ;;  %v4273_v43 = vand.u32 2147483647, %v2469_v10  ;;  %v879_v51 = vshll.u32 %v4347_v15, %v2689_v49 }
 0x229   :  { %v756_v37 = vand.u32 8388607, %v4359_v56  ;;  %v2818_v11 = vor.u32 %v767_v41, %v766_v23  ;;  %v871_v33 = vshrl.u32 %v4348_v16, %v2730_v12  ;;  %v874_v56 = vshrl.u32 %v4349_v29, %v2730_v12 }
 0x22a   :  { %v877_v61 = vshrl.u32 %v4347_v15, %v2730_v12  ;;  %v2826_v39 = vor.u32 %v770_v60, %v769_v34  ;;  %v2828_v18 = vor.u32 %v773_v57, %v772_v28  ;;  %v881_v55 = vor.u32 %v880_v21, %v879_v51 }
 0x22b   :  { %v883_v31 = vshrl.u32 %v4346_v58, %v2730_v12  ;;  %vm784_vm8 = vcmp.lt.s32.totalorder %v2676_v36, 4  ;;  %v870_v23 = vshll.u32 %v4350_v26, %v2689_v49  ;;  %v873_v44 = vshll.u32 %v4348_v16, %v2689_v49 }
 0x22c   :  { %v876_v41 = vshll.u32 %v4349_v29, %v2689_v49  ;;  %v790_v34 = vsel %vm784_vm8, %v777_v42, 920167782  ;;  %v794_v51 = vsel %vm784_vm8, %v780_v25, 1326507024  ;;  %v860_v28 = vand.u32 8388607, %v4273_v43 }
 0x22d   :  { %v882_v63 = vshll.u32 %v4345_v45, %v2689_v49  ;;  %v2847_v60 = vor.u32 %v871_v33, %v870_v23  ;;  %v2849_v57 = vor.u32 %v874_v56, %v873_v44  ;;  %vm888_vm9 = vcmp.lt.s32.totalorder %v2680_v52, 4 }
 0x22e   :  { %v2851_v21 = vor.u32 %v877_v61, %v876_v41  ;;  %vm781_vm10 = vcmp.lt.s32.totalorder %v2676_v36, 1  ;;  %vm783_vm11 = vcmp.lt.s32.totalorder %v2676_v36, 3  ;;  %v894_v25 = vsel %vm888_vm9, %v881_v55, 920167782 }
 0x22f   :  { %v884_v38 = vor.u32 %v883_v31, %v882_v63  ;;  %v757_v43 = vor.u32 8388608, %v756_v37  ;;  %vm782_vm12 = vcmp.lt.s32.totalorder %v2676_v36, 2  ;;  %v789_v49 = vsel %vm781_vm10, %v2818_v11, %v2826_v39 }
 0x230   :  { %v791_v33 = vsel %vm783_vm11, %v2828_v18, %v790_v34  ;;  %v793_v56 = vsel %vm781_vm10, %v2826_v39, %v2828_v18  ;;  %v795_v61 = vsel %vm783_vm11, %v777_v42, %v794_v51  ;;  %vm885_vm13 = vcmp.lt.s32.totalorder %v2680_v52, 1 }
 0x231   :  { %vm887_vm14 = vcmp.lt.s32.totalorder %v2680_v52, 3  ;;  %v861_v37 = vor.u32 8388608, %v860_v28  ;;  %v893_v31 = vsel %vm885_vm13, %v2847_v60, %v2849_v57  ;;  %v898_v41 = vsel %vm888_vm9, %v884_v38, 1326507024 }
 0x232   :  { %v895_v23 = vsel %vm887_vm14, %v2851_v21, %v894_v25  ;;  %v975_v42 = vshrl.u32 %v4348_v16, %v2661_v50  ;;  %v978_v34 = vshrl.u32 %v4349_v29, %v2661_v50  ;;  %v981_v51 = vshrl.u32 %v4347_v15, %v2661_v50 }
 0x233   :  { %v2890_v28 = vadd.s32 %v704_v22, %v700_v7  ;;  %v792_v63 = vsel %vm782_vm12, %v789_v49, %v791_v33  ;;  %v796_v25 = vsel %vm782_vm12, %v793_v56, %v795_v61  ;;  %v2896_v44 = vshll.u32 %v757_v43, 8 }
 0x234   :  { %vm886_vm15 = vcmp.lt.s32.totalorder %v2680_v52, 2  ;;  %v974_v38 = vshll.u32 %v4350_v26, %v2642_v4  ;;  %v977_v10 = vshll.u32 %v4348_v16, %v2642_v4  ;;  %v980_v7 = vshll.u32 %v4349_v29, %v2642_v4 }
 0x235   :  { %v896_v22 = vsel %vm886_vm15, %v893_v31, %v895_v23  ;;  %v897_v43 = vsel %vm885_vm13, %v2849_v57, %v2851_v21  ;;  %v899_v49 = vsel %vm887_vm14, %v881_v55, %v898_v41  ;;  %v4360_v33 = vand.u32 2147483647, %v2474_v17 }
 0x236   :  { %v2915_v61 = vshll.u32 %v861_v37, 8  ;;  %v2917_v0 = vor.u32 %v975_v42, %v974_v38  ;;  %v2919_v54 = vor.u32 %v978_v34, %v977_v10  ;;  %v982_v4 = vor.u32 %v981_v51, %v980_v7 }
 0x237   :  { %v964_v56 = vand.u32 8388607, %v4360_v33  ;;  %v2922_v31 = vmul.u32.u64.low %v2896_v44, %v796_v25  ;;  %v2923_v23 = vmul.u32.u64.high %v2896_v44, %v796_v25, %v2922_v31  ;;  %v2931_v55 = vand.u32 31, %v2739_v2 }
 0x238   :  { %v2926_v5 = vmul.u32.u64.low %v2896_v44, %v792_v63  ;;  %v2927_v1 = vmul.u32.u64.high %v2896_v44, %v792_v63, %v2926_v5  ;;  %v900_v37 = vsel %vm886_vm15, %v897_v43, %v899_v49  ;;  %v607_v42 = vsub.s32 0, %v2792_v19 }
 0x239   :  { %v2936_v41 = vmul.u32.u64.low %v2915_v61, %v896_v22  ;;  %v2937_v10 = vmul.u32.u64.high %v2915_v61, %v896_v22, %v2936_v41  ;;  %v965_v34 = vor.u32 8388608, %v964_v56  ;;  %vm989_vm0 = vcmp.lt.s32.totalorder %v2710_v24, 1 }
 0x23a   :  { %vm991_vm1 = vcmp.lt.s32.totalorder %v2710_v24, 3  ;;  %v997_v2 = vsel %vm989_vm0, %v2917_v0, %v2919_v54  ;;  %v1001_v63 = vsel %vm989_vm0, %v2919_v54, %v982_v4  ;;  %v706_v38 = vadd.s32 536870912, %v2890_v28 }
 0x23b   :  { %v999_v51 = vsel %vm991_vm1, %v982_v4, %v2761_v9  ;;  %v1003_v25 = vsel %vm991_vm1, %v2716_v32, %v2776_v53  ;;  %v786_v7 = vsel %vm784_vm8, %v2828_v18, 2102212464  ;;  %v1088_v9 = vshrl.u32 %v4345_v45, %v2764_v13 }
 0x23c   :  { %v2962_v22 = vmul.u32.u64.low %v2915_v61, %v900_v37  ;;  %v2963_v43 = vmul.u32.u64.high %v2915_v61, %v900_v37, %v2962_v22  ;;  %v2969_v49 = vshrl.u32 %v4346_v58, %v2764_v13  ;;  %v765_v32 = vshrl.u32 %v4350_v26, %v2727_v30 }
 0x23d   :  { %vm990_vm2 = vcmp.lt.s32.totalorder %v2710_v24, 2  ;;  %v2975_v53 = vsub.s32 32, %v2931_v55  ;;  %v2019_v18 = vmin.u32 %v607_v42, %v2792_v19  ;;  %v787_v30 = vsel %vm783_vm11, %v2826_v39, %v786_v7 }
 0x23e   :  { %v1000_v33 = vsel %vm990_vm2, %v997_v2, %v999_v51  ;;  %v1004_v56 = vsel %vm990_vm2, %v1001_v63, %v1003_v25  ;;  %v785_v31 = vsel %vm781_vm10, %v765_v32, %v2818_v11  ;;  %v890_v37 = vsel %vm888_vm9, %v2851_v21, 2102212464 }
 0x23f   :  { %v2991_v22 = vshll.u32 %v965_v34, 8  ;;  %v2993_v42 = vshrl.u32 %v706_v38, 30  ;;  %vm806_vm3 = vc.u32 %v2923_v23, %v2926_v5  ;;  %v807_v2 = vadd.s32 1, %v2927_v1 }
 0x240   :  { %v869_v11 = vshrl.u32 %v4350_v26, %v2730_v12  ;;  %vm1096_vm4 = vcmp.lt.s32.totalorder %v2736_v3, 4  ;;  %v1191_v21 = vshll.u32 %v4347_v15, %v2931_v55  ;;  %v788_v34 = vsel %vm782_vm12, %v785_v31, %v787_v30 }
 0x241   :  { %v3001_v51 = vmul.u32.u64.low %v2991_v22, %v1004_v56  ;;  %v3002_v63 = vmul.u32.u64.high %v2991_v22, %v1004_v56, %v3001_v51  ;;  %v3005_v39 = vmul.u32.u64.low %v2991_v22, %v1000_v33  ;;  %v3006_v25 = vmul.u32.u64.high %v2991_v22, %v1000_v33, %v3005_v39 }
 0x242   :  { %v889_v12 = vsel %vm885_vm13, %v869_v11, %v2847_v60  ;;  %v891_v38 = vsel %vm887_vm14, %v2849_v57, %v890_v37  ;;  %v1089_v7 = vor.u32 %v1088_v9, %v2768_v47  ;;  %v1092_v32 = vor.u32 %v2969_v49, %v2772_v46 }
 0x243   :  { %v609_v33 = vclz %v2019_v18  ;;  %v911_v56 = vadd.s32 1, %v2937_v10  ;;  %v3026_v36 = vshll.u32 %v4345_v45, %v2931_v55  ;;  %v708_v31 = vshll.u32 %v2993_v42, 30 }
 0x244   :  { %v808_v60 = vsel %vm806_vm3, %v807_v2, %v2927_v1  ;;  %vm910_vm5 = vc.u32 %v2963_v43, %v2936_v41  ;;  %v804_v47 = vmul.u32 %v2896_v44, %v788_v34  ;;  %v892_v46 = vsel %vm886_vm15, %v889_v12, %v891_v38 }
 0x245   :  { %v973_v57 = vshrl.u32 %v4350_v26, %v2661_v50  ;;  %v994_v9 = vsel %vm992_vm6, %v982_v4, 2102212464  ;;  %v4282_v49 = vand.u32 2147483647, %v2517_v8  ;;  %v1079_v18 = vshrl.u32 %v4348_v16, %v2764_v13 }
 0x246   :  { %v1082_v1 = vshrl.u32 %v4349_v29, %v2764_v13  ;;  %v1085_v44 = vshrl.u32 %v4347_v15, %v2764_v13  ;;  %v2020_v30 = vadd.s32 4294967294, %v609_v33  ;;  %v809_v52 = vadd.s32 %v808_v60, %v804_v47 }
 0x247   :  { %v912_v37 = vsel %vm910_vm5, %v911_v56, %v2937_v10  ;;  %v993_v50 = vsel %vm989_vm0, %v973_v57, %v2917_v0  ;;  %v995_v4 = vsel %vm991_vm1, %v2919_v54, %v994_v9  ;;  %v1078_v2 = vshll.u32 %v4350_v26, %v2718_v40 }
 0x248   :  { %v1081_v11 = vshll.u32 %v4348_v16, %v2718_v40  ;;  %v1084_v51 = vshll.u32 %v4349_v29, %v2718_v40  ;;  %v3063_v34 = vsub.s32 %v2890_v28, %v708_v31  ;;  %v908_v10 = vmul.u32 %v2915_v61, %v892_v46 }
 0x249   :  { %vm1014_vm6 = vc.u32 %v3002_v63, %v3005_v39  ;;  %v1015_v0 = vadd.s32 1, %v3006_v25  ;;  %v1068_v54 = vand.u32 8388607, %v4282_v49  ;;  %v1080_v12 = vor.u32 %v1079_v18, %v1078_v2 }
 0x24a   :  { %v3071_v38 = vor.u32 %v1082_v1, %v1081_v11  ;;  %v1086_v33 = vor.u32 %v1085_v44, %v1084_v51  ;;  %v1102_v40 = vsel %vm1096_vm4, %v1089_v7, 920167782  ;;  %v810_v56 = vadd.s32 536870912, %v809_v52 }
 0x24b   :  { %v3075_v28 = vadd.s32 %v912_v37, %v908_v10  ;;  %v996_v61 = vsel %vm990_vm2, %v993_v50, %v995_v4  ;;  %v1106_v31 = vsel %vm1096_vm4, %v1092_v32, 1326507024  ;;  %v1192_v60 = vshrl.u32 %v4345_v45, %v2975_v53 }
 0x24c   :  { %v1195_v47 = vshrl.u32 %v4346_v58, %v2975_v53  ;;  %vm2021_vm7 = vcmp.lt.s32.totalorder %v2020_v30, 0  ;;  %v711_v46 = vsub.s32 0, %v3063_v34  ;;  %v1016_v57 = vsel %vm1014_vm6, %v1015_v0, %v3006_v25 }
 0x24d   :  { %vm1093_vm8 = vcmp.lt.s32.totalorder %v2736_v3, 1  ;;  %vm1095_vm9 = vcmp.lt.s32.totalorder %v2736_v3, 3  ;;  %v1012_v24 = vmul.u32 %v2991_v22, %v996_v61  ;;  %v1069_v9 = vor.u32 8388608, %v1068_v54 }
 0x24e   :  { %v1101_v32 = vsel %vm1093_vm8, %v1080_v12, %v3071_v38  ;;  %v1103_v18 = vsel %vm1095_vm9, %v1086_v33, %v1102_v40  ;;  %v3095_v1 = vshrl.u32 %v810_v56, 30  ;;  %v914_v44 = vadd.s32 536870912, %v3075_v28 }
 0x24f   :  { %v1105_v25 = vsel %vm1093_vm8, %v3071_v38, %v1086_v33  ;;  %v1107_v37 = vsel %vm1095_vm9, %v1089_v7, %v1106_v31  ;;  %v3105_v22 = vmul.f32 %v2562_v62, %v2720_v6  ;;  %v3109_v50 = vadd.f32 %v2734_v59, %v2569_v48 }
 0x250   :  { %v3111_v4 = vadd.s32 %v1016_v57, %v1012_v24  ;;  %vm1094_vm10 = vcmp.lt.s32.totalorder %v2736_v3, 2  ;;  %v1193_v2 = vor.u32 %v1192_v60, %v1191_v21  ;;  %v1196_v11 = vor.u32 %v1195_v47, %v3026_v36 }
 0x251   :  { %4361 = vst [vmem:[#allocation45_spill] sm:$0xff] %v3109_v50  ;;  %v3116_v51 = vand.u32 31, %v2751_v27  ;;  %v1104_v7 = vsel %vm1094_vm10, %v1101_v32, %v1103_v18  ;;  %v3121_v6 = vsel %vm2021_vm7, 0, %v2020_v30  ;;  %v2023_v10 = vmin.u32 %v711_v46, %v3063_v34 }
 0x252   :  { %v1108_v48 = vsel %vm1094_vm10, %v1105_v25, %v1107_v37  ;;  %v3126_v59 = vshll.u32 %v1069_v9, 8  ;;  %vm1200_vm11 = vcmp.lt.s32.totalorder %v2779_v14, 4  ;;  %v3130_v21 = vshrl.u32 %v2751_v27, 5 }
 0x253   :  { %v812_v36 = vshll.u32 %v3095_v1, 30  ;;  %v3133_v0 = vshrl.u32 %v914_v44, 30  ;;  %v1018_v54 = vadd.s32 536870912, %v3111_v4  ;;  %v4281_v56 = vand.u32 2147483647, %v2538_v20 }
 0x254   :  { %v3137_v30 = vmul.u32.u64.low %v3126_v59, %v1104_v7  ;;  %v3138_v40 = vmul.u32.u64.high %v3126_v59, %v1104_v7, %v3137_v30  ;;  %v3143_v61 = vsub.s32 32, %v3116_v51  ;;  %v617_v31 = vsub.s32 4294967266, %v3121_v6 }
 0x255   :  { %v3147_v27 = vmul.u32.u64.low %v3126_v59, %v1108_v48  ;;  %v3148_v60 = vmul.u32.u64.high %v3126_v59, %v1108_v48, %v3147_v27  ;;  %v1206_v47 = vsel %vm1200_vm11, %v1193_v2, 920167782  ;;  %v1210_v46 = vsel %vm1200_vm11, %v1196_v11, 1326507024 }
 0x256   :  { %v713_v24 = vclz %v2023_v10  ;;  %v3155_v9 = vsub.s32 %v809_v52, %v812_v36  ;;  %v916_v32 = vshll.u32 %v3133_v0, 30  ;;  %v1077_v18 = vshrl.u32 %v4350_v26, %v2764_v13 }
 0x257   :  { %v1098_v44 = vsel %vm1096_vm4, %v1086_v33, 2102212464  ;;  %v3162_v25 = vshrl.u32 %v1018_v54, 30  ;;  %v1172_v37 = vand.u32 8388607, %v4281_v56  ;;  %v1182_v11 = vshll.u32 %v4350_v26, %v2931_v55 }
 0x258   :  { %v1183_v52 = vshrl.u32 %v4348_v16, %v2975_v53  ;;  %v618_v7 = vadd.s32 127, %v617_v31  ;;  %v1097_v10 = vsel %vm1093_vm8, %v1077_v18, %v1080_v12  ;;  %v1185_v13 = vshll.u32 %v4348_v16, %v2931_v55 }
 0x259   :  { %v1186_v33 = vshrl.u32 %v4349_v29, %v2975_v53  ;;  %v1099_v48 = vsel %vm1095_vm9, %v3071_v38, %v1098_v44  ;;  %v1188_v54 = vshll.u32 %v4349_v29, %v2931_v55  ;;  %v1189_v31 = vshrl.u32 %v4347_v15, %v2975_v53 }
 0x25a   :  { %v1184_v36 = vor.u32 %v1183_v52, %v1182_v11  ;;  %v2024_v27 = vadd.s32 4294967294, %v713_v24  ;;  %v815_v12 = vsub.s32 0, %v3155_v9  ;;  %v3185_v18 = vsub.s32 %v3075_v28, %v916_v32 }
 0x25b   :  { %v1187_v56 = vor.u32 %v1186_v33, %v1185_v13  ;;  %v1020_v49 = vshll.u32 %v3162_v25, 30  ;;  %v1119_v57 = vadd.s32 1, %v3138_v40  ;;  %v1173_v50 = vor.u32 8388608, %v1172_v37 }
 0x25c   :  { %v1190_v38 = vor.u32 %v1189_v31, %v1188_v54  ;;  %v1100_v44 = vsel %vm1094_vm10, %v1097_v10, %v1099_v48  ;;  %vm1118_vm12 = vc.u32 %v3148_v60, %v3137_v30  ;;  %vm1197_vm13 = vcmp.lt.s32.totalorder %v2779_v14, 1 }
 0x25d   :  { %vm1199_vm14 = vcmp.lt.s32.totalorder %v2779_v14, 3  ;;  %v1205_v55 = vsel %vm1197_vm13, %v1184_v36, %v1187_v56  ;;  %vm2025_vm15 = vcmp.lt.s32.totalorder %v2024_v27, 0  ;;  %v2027_v32 = vmin.u32 %v815_v12, %v3155_v9 }
 0x25e   :  { %v1207_v28 = vsel %vm1199_vm14, %v1190_v38, %v1206_v47  ;;  %v1209_v24 = vsel %vm1197_vm13, %v1187_v56, %v1190_v38  ;;  %v1211_v3 = vsel %vm1199_vm14, %v1193_v2, %v1210_v46  ;;  %v919_v37 = vsub.s32 0, %v3185_v18 }
 0x25f   :  { %vm1198_vm0 = vcmp.lt.s32.totalorder %v2779_v14, 2  ;;  %v1120_v11 = vsel %vm1118_vm12, %v1119_v57, %v3138_v40  ;;  %v1202_v52 = vsel %vm1200_vm11, %v1190_v38, 2102212464  ;;  %v1213_v10 = vshll.u32 %v1173_v50, 8 }
 0x260   :  { %v1212_v47 = vsel %vm1198_vm0, %v1209_v24, %v1211_v3  ;;  %v3212_v13 = vsub.s32 %v3111_v4, %v1020_v49  ;;  %v1116_v2 = vmul.u32 %v3126_v59, %v1100_v44  ;;  %v1181_v46 = vshrl.u32 %v4350_v26, %v2975_v53  ;;  %v4362_v53 = vld [vmem:[#allocation32_spill] sm:$0xff] }
 0x261   :  { %v1208_v33 = vsel %vm1198_vm0, %v1205_v55, %v1207_v28  ;;  %v619_v48 = vshll.u32 %v618_v7, 23  ;;  %v3219_v40 = vsel %vm2025_vm15, 0, %v2024_v27  ;;  %v2031_v31 = vmin.u32 %v919_v37, %v3185_v18 }
 0x262   :  { %v3221_v57 = vmul.u32.u64.low %v1213_v10, %v1212_v47  ;;  %v3222_v54 = vmul.u32.u64.high %v1213_v10, %v1212_v47, %v3221_v57  ;;  %v3225_v50 = vadd.s32 %v1120_v11, %v1116_v2  ;;  %v1201_v49 = vsel %vm1197_vm13, %v1181_v46, %v1184_v36 }
 0x263   :  { %v1203_v4 = vsel %vm1199_vm14, %v1187_v56, %v1202_v52  ;;  %v597_v59 = vadd.s32 %v4362_v53, %v2586_v35  ;;  %v817_v12 = vclz %v2027_v32  ;;  %v1295_v38 = vshll.u32 %v4347_v15, %v3116_v51  ;;  %v4365_v57 = vld [vmem:[#allocation40_spill] sm:$0xff] }
 0x264   :  { %v3233_v7 = vmul.u32.u64.low %v1213_v10, %v1208_v33  ;;  %v3234_v27 = vmul.u32.u64.high %v1213_v10, %v1208_v33, %v3233_v7  ;;  %v1296_v44 = vshrl.u32 %v4345_v45, %v3143_v61  ;;  %v3243_v36 = vshrl.u32 %v4346_v58, %v3143_v61 }
 0x265   :  { %v1023_v56 = vsub.s32 0, %v3212_v13  ;;  %v3248_v35 = vshll.u32 %v4345_v45, %v3116_v51  ;;  %v4363_v55 = vsub.s32 32, %v3121_v6  ;;  %v721_v24 = vsub.s32 4294967266, %v3219_v40 }
 0x266   :  { %v1204_v3 = vsel %vm1198_vm0, %v1201_v49, %v1203_v4  ;;  %v620_v32 = vor.u32 4788187, %v619_v48  ;;  %v921_v37 = vclz %v2031_v31  ;;  %v1122_v11 = vadd.s32 536870912, %v3225_v50  ;;  %v4364_v48 = vld [vmem:[#allocation41_spill] sm:$0xff] }
 0x267   :  { %v615_v28 = vshrl.u32 %v597_v59, %v4363_v55  ;;  %vm1222_vm1 = vc.u32 %v3222_v54, %v3233_v7  ;;  %vm1304_vm2 = vcmp.lt.s32.totalorder %v3130_v21, 4  ;;  %v614_v45 = vshll.u32 %v2792_v19, %v3121_v6 }
 0x268   :  { %v2028_v58 = vadd.s32 4294967294, %v817_v12  ;;  %v1223_v52 = vadd.s32 1, %v3234_v27  ;;  %v3262_v47 = vor.u32 %v1296_v44, %v1295_v38  ;;  %v1300_v14 = vor.u32 %v3243_v36, %v3248_v35  ;;  %v4366_v12 = vld [vmem:[#allocation31_spill] sm:$0xff] }
 0x269   :  { %v2035_v2 = vmin.u32 %v1023_v56, %v3212_v13  ;;  %v1220_v46 = vmul.u32 %v1213_v10, %v1204_v3  ;;  %v616_v33 = vor.u32 %v615_v28, %v614_v45  ;;  %v701_v31 = vadd.s32 %v4365_v57, %v4364_v48 }
 0x26a   :  { %v722_v49 = vadd.s32 127, %v721_v24  ;;  %v1224_v4 = vsel %vm1222_vm1, %v1223_v52, %v3234_v27  ;;  %v621_v53 = vand.u32 2147483647, %v620_v32  ;;  %v2032_v19 = vadd.s32 4294967294, %v921_v37 }
 0x26b   :  { %v3270_v6 = vshrl.u32 %v1122_v11, 30  ;;  %v1225_v59 = vadd.s32 %v1224_v4, %v1220_v46  ;;  %vm2029_vm3 = vcmp.lt.s32.totalorder %v2028_v58, 0  ;;  %v1269_v38 = vand.u32 2147483647, %v4366_v12 }
 0x26c   :  { %v1287_v44 = vshrl.u32 %v4348_v16, %v3143_v61  ;;  %v1290_v10 = vshrl.u32 %v4349_v29, %v3143_v61  ;;  %v717_v36 = vsub.s32 32, %v3219_v40  ;;  %v1025_v56 = vclz %v2035_v2 }
 0x26d   :  { %v1226_v35 = vadd.s32 536870912, %v1225_v59  ;;  %v1293_v27 = vshrl.u32 %v4347_v15, %v3143_v61  ;;  %v723_v55 = vshll.u32 %v722_v49, 23  ;;  %v1286_v28 = vshll.u32 %v4350_v26, %v3116_v51 }
 0x26e   :  { %v1289_v24 = vshll.u32 %v4348_v16, %v3116_v51  ;;  %v1292_v3 = vshll.u32 %v4349_v29, %v3116_v51  ;;  %v623_v32 = vcvt.s32.f32 %v616_v33  ;;  %v3286_v37 = vsel %vm2029_vm3, 0, %v2028_v58  ;;  %v4367_v29 = vld [vmem:[#allocation33_spill] sm:$0xff]  ;;  %v4368_v51 = vld [vmem:[#allocation43_spill] sm:$0xff] }
 0x26f   :  { %vm2033_vm4 = vcmp.lt.s32.totalorder %v2032_v19, 0  ;;  %v1124_v11 = vshll.u32 %v3270_v6, 30  ;;  %v1276_v45 = vand.u32 8388607, %v1269_v38  ;;  %v1288_v15 = vor.u32 %v1287_v44, %v1286_v28 }
 0x270   :  { %v1291_v52 = vor.u32 %v1290_v10, %v1289_v24  ;;  %v1294_v2 = vor.u32 %v1293_v27, %v1292_v3  ;;  %v1310_v46 = vsel %vm1304_vm2, %v3262_v47, 920167782  ;;  %v624_v16 = vmul.f32 %v623_v32, %v621_v53  ;;  %v4369_v53 = vld [vmem:[#allocation12_spill] sm:$0xff] }
 0x271   :  { %v2036_v48 = vadd.s32 4294967294, %v1025_v56  ;;  %v3294_v57 = vshrl.u32 %v1226_v35, 30  ;;  %v3298_v58 = vadd.f32 %v4368_v51, %v4367_v29  ;;  %v718_v33 = vshll.u32 %v3063_v34, %v3219_v40 }
 0x272   :  { %v719_v49 = vshrl.u32 %v701_v31, %v717_v36  ;;  %v724_v4 = vor.u32 4788187, %v723_v55  ;;  %v825_v44 = vsub.s32 4294967266, %v3286_v37  ;;  %v3303_v10 = vsel %vm2033_vm4, 0, %v2032_v19 }
 0x273   :  { %vm1301_vm5 = vcmp.lt.s32.totalorder %v3130_v21, 1  ;;  %vm1303_vm6 = vcmp.lt.s32.totalorder %v3130_v21, 3  ;;  %vm543_vm7 = vcmp.lt.s32.totalorder %v4369_v53, 0  ;;  %v3309_v56 = vsub.s32 %v3225_v50, %v1124_v11 }
 0x274   :  { %v1277_v35 = vor.u32 8388608, %v1276_v45  ;;  %v1309_v27 = vsel %vm1301_vm5, %v1288_v15, %v1291_v52  ;;  %v1311_v34 = vsel %vm1303_vm6, %v1294_v2, %v1310_v46  ;;  %v1314_v40 = vsel %vm1304_vm2, %v1300_v14, 1326507024 }
 0x275   :  { %v625_v31 = vxor.u32 2147483648, %v624_v16  ;;  %vm2037_vm8 = vcmp.lt.s32.totalorder %v2036_v48, 0  ;;  %v1228_v19 = vshll.u32 %v3294_v57, 30  ;;  %v720_v36 = vor.u32 %v719_v49, %v718_v33 }
 0x276   :  { %v725_v55 = vand.u32 2147483647, %v724_v4  ;;  %vm1302_vm9 = vcmp.lt.s32.totalorder %v3130_v21, 2  ;;  %v1313_v50 = vsel %vm1301_vm5, %v1291_v52, %v1294_v2  ;;  %v821_v28 = vsub.s32 32, %v3286_v37 }
 0x277   :  { %v826_v24 = vadd.s32 127, %v825_v44  ;;  %v929_v3 = vsub.s32 4294967266, %v3303_v10  ;;  %v1312_v32 = vsel %vm1302_vm9, %v1309_v27, %v1311_v34  ;;  %v4370_v14 = vand.u32 2147483647, %v4369_v53 }
 0x278   :  { %v3331_v45 = vsel %vm2037_vm8, 0, %v2036_v48  ;;  %v1127_v46 = vsub.s32 0, %v3309_v56  ;;  %v1315_v29 = vsel %vm1303_vm6, %v3262_v47, %v1314_v40  ;;  %v1317_v51 = vshll.u32 %v1277_v35, 8 }
 0x279   :  { %vm3327_vm10 = vcmp.le.f32.partialorder %v4370_v14, 0.7853982  ;;  %v3337_v33 = vsub.s32 %v1225_v59, %v1228_v19  ;;  %v1285_v49 = vshrl.u32 %v4350_v26, %v3143_v61  ;;  %v1306_v4 = vsel %vm1304_vm2, %v1294_v2, 2102212464 }
 0x27a   :  { %v1316_v44 = vsel %vm1302_vm9, %v1313_v50, %v1315_v29  ;;  %v3348_v34 = vmul.u32.u64.low %v1317_v51, %v1312_v32  ;;  %v3349_v14 = vmul.u32.u64.high %v1317_v51, %v1312_v32, %v3348_v34  ;;  %v727_v47 = vcvt.s32.f32 %v720_v36  ;;  %v4373_v32 = vld [vmem:[#allocation42_spill] sm:$0xff] }
 0x27b   :  { %v3345_v48 = vmul.u32.u64.low %v1317_v51, %v1316_v44  ;;  %v3346_v27 = vmul.u32.u64.high %v1317_v51, %v1316_v44, %v3345_v48  ;;  %v805_v59 = vadd.s32 %v2926_v5, %v2923_v23  ;;  %v827_v35 = vshll.u32 %v826_v24, 23  ;;  %v181_v23 = vpop.xlane.xlu1 %180 }
 0x27c   :  { %v930_v40 = vadd.s32 127, %v929_v3  ;;  %v1033_v26 = vsub.s32 4294967266, %v3331_v45  ;;  %v2039_v61 = vmin.u32 %v1127_v46, %v3309_v56  ;;  %v1305_v2 = vsel %vm1301_vm5, %v1285_v49, %v1288_v15 }
 0x27d   :  { %v1307_v19 = vsel %vm1303_vm6, %v1291_v52, %v1306_v4  ;;  %v626_v50 = vsel %vm543_vm7, %v625_v31, %v624_v16  ;;  %v627_v36 = vsub.s32 4, %v4373_v32  ;;  %v823_v29 = vshrl.u32 %v805_v59, %v821_v28  ;;  %v2181_v4 = vld [vmem:[#allocation2 + $0x80] sm:$0xf] }
 0x27e   :  { %v925_v5 = vsub.s32 32, %v3303_v10  ;;  %v728_v24 = vmul.f32 %v727_v47, %v725_v55  ;;  %v822_v3 = vshll.u32 %v3155_v9, %v3286_v37  ;;  %v909_v46 = vadd.s32 %v2936_v41, %v2963_v43 }
 0x27f   :  { %v1231_v15 = vsub.s32 0, %v3337_v33  ;;  %v828_v49 = vor.u32 4788187, %v827_v35  ;;  %v931_v52 = vshll.u32 %v930_v40, 23  ;;  %v1308_v16 = vsel %vm1302_vm9, %v1305_v2, %v1307_v19 }
 0x280   :  { %vm1326_vm11 = vc.u32 %v3346_v27, %v3348_v34  ;;  %v1034_v31 = vadd.s32 127, %v1033_v26  ;;  %v1129_v28 = vclz %v2039_v61  ;;  %v1327_v55 = vadd.s32 1, %v3349_v14 }
 0x281   :  { %v185_v44 = vadd.f32 %v2181_v4, %v181_v23  ;;  %v628_v41 = vsel %vm543_vm7, %v627_v36, %v4373_v32  ;;  %v629_v43 = vsel %vm3327_vm10, %v4369_v53, %v626_v50  ;;  %v824_v9 = vor.u32 %v823_v29, %v822_v3 }
 0x282   :  { %v927_v21 = vshrl.u32 %v909_v46, %v925_v5  ;;  %v1029_v37 = vsub.s32 32, %v3331_v45  ;;  %v2043_v48 = vmin.u32 %v1231_v15, %v3337_v33  ;;  %v1324_v47 = vmul.u32 %v1317_v51, %v1308_v16  ;;  %v4374_v51 = vld [vmem:[#allocation19_spill] sm:$0xff]  ;;  %v2182_v46 = vld [vmem:[#allocation2 + $0xa0] sm:$0x3f]  ;;  %v4377_v16 = vld [vmem:[#allocation44_spill] sm:$0xff] }
 0x283   :  { %v1328_v59 = vsel %vm1326_vm11, %v1327_v55, %v3349_v14  ;;  %250 = vperm.xlu0 %2123, %v185_v44   ;;  %v729_v35 = vxor.u32 2147483648, %v728_v24  ;;  %v829_v40 = vand.u32 2147483647, %v828_v49  ;;  %v926_v26 = vshll.u32 %v3185_v18, %v3303_v10 }
 0x284   :  { %v932_v61 = vor.u32 4788187, %v931_v52  ;;  %v1013_v2 = vadd.s32 %v3005_v39, %v3002_v63  ;;  %v1035_v19 = vshll.u32 %v1034_v31, 23  ;;  %v2040_v50 = vadd.s32 4294967294, %v1129_v28  ;;  %v4376_v52 = vld [vmem:[#allocation34_spill] sm:$0xff]  ;;  %v4378_v28 = vld [vmem:[#allocation35_spill] sm:$0xff] }
 0x285   :  { %v3387_v32 = vadd.s32 %v1328_v59, %v1324_v47  ;;  %v630_v36 = vsel %vm3327_vm10, 0, %v628_v41  ;;  %vm647_vm12 = vcmp.lt.s32.totalorder %v4374_v51, 0  ;;  %v831_v14 = vcvt.s32.f32 %v824_v9  ;;  %v321_v9 = vpop.permute.xlu0 %320  ;;  %v4382_v47 = vld [vmem:[#allocation23_spill] sm:$0xff] }
 0x286   :  { %v928_v29 = vor.u32 %v927_v21, %v926_v26  ;;  %2133 = vcosq.f32 %v629_v43  ;;  %v731_v5 = vsub.s32 4, %v2993_v42  ;;  %v1031_v23 = vshrl.u32 %v1013_v2, %v1029_v37  ;;  %v4384_v2 = vld [vmem:[#allocation29_spill] sm:$0xff] }
 0x287   :  { %v1233_v18 = vclz %v2043_v48  ;;  %v4375_v10 = vmov 9   ;;  %2135 = vsinq.f32 %v629_v43  ;;  %v730_v63 = vsel %vm647_vm12, %v729_v35, %v728_v24 }
 0x288   :  { %2126 = vset.pattern.permute.xlu0 %v4375_v10  ;;  %v832_v39 = vmul.f32 %v831_v14, %v829_v40  ;;  %v933_v3 = vand.u32 2147483647, %v932_v61  ;;  %v1030_v11 = vshll.u32 %v3212_v13, %v3331_v45  ;;  %v1036_v15 = vor.u32 4788187, %v1035_v19  ;;  %v4383_v61 = vld [vmem:[#allocation30_spill] sm:$0xff]  ;;  %v4385_v14 = vld [vmem:[#allocation24_spill] sm:$0xff] }
 0x289   :  { %1668 = vperm.xlu0 %2126, %v2182_v46   ;;  %vm2041_vm13 = vcmp.lt.s32.totalorder %v2040_v50, 0  ;;  %v1330_v49 = vadd.s32 536870912, %v3387_v32  ;;  %v3401_v31 = vadd.f32 %v4377_v16, %v4376_v52  ;;  %v3405_v55 = vadd.f32 %v3105_v22, %v4378_v28 }
 0x28a   :  { %v4379_v24 = vand.u32 2147483647, %v4374_v51  ;;  %v935_v44 = vcvt.s32.f32 %v928_v29  ;;  %v634_v13 = vadd.s32 3, %v630_v36  ;;  %v732_v45 = vsel %vm647_vm12, %v731_v5, %v2993_v42 }
 0x28b   :  { %v1032_v41 = vor.u32 %v1031_v23, %v1030_v11  ;;  %v2044_v43 = vadd.s32 4294967294, %v1233_v18  ;;  %v833_v21 = vxor.u32 2147483648, %v832_v39  ;;  %v3419_v48 = vsel %vm2041_vm13, 0, %v2040_v50 }
 0x28c   :  { %vm3409_vm14 = vcmp.le.f32.partialorder %v4379_v24, 0.7853982  ;;  %v936_v37 = vmul.f32 %v935_v44, %v933_v3  ;;  %v363_v59 = vmul.f32 %v4382_v47, %v321_v9  ;;  %v835_v35 = vsub.s32 4, %v3095_v1  ;;  %v4390_v24 = vld [vmem:[#allocation37_spill] sm:$0xff] }
 0x28d   :  { %v733_v22 = vsel %vm3409_vm14, %v4374_v51, %v730_v63  ;;  %v1037_v40 = vand.u32 2147483647, %v1036_v15  ;;  %v3423_v26 = vshrl.u32 %v1330_v49, 30  ;;  %v364_v42 = vmul.f32 %v4383_v61, %v321_v9  ;;  %v4386_v49 = vld [vmem:[#allocation36_spill] sm:$0xff]  ;;  %v4391_v44 = vld [vmem:[#allocation25_spill] sm:$0xff] }
 0x28e   :  { %v3427_v19 = vmul.f32 %v4384_v2, %v321_v9  ;;  %v734_v36 = vsel %vm3409_vm14, 0, %v732_v45  ;;  %vm751_vm15 = vcmp.lt.s32.totalorder %v4385_v14, 0  ;;  %2137 = vcosq.f32 %v733_v22 }
 0x28f   :  { %v1039_v50 = vcvt.s32.f32 %v1032_v41  ;;  %v1137_v29 = vsub.s32 4294967266, %v3419_v48  ;;  %vm2045_vm0 = vcmp.lt.s32.totalorder %v2044_v43, 0  ;;  %v3434_v5 = vmul.f32 %v2562_v62, %v321_v9 }
 0x290   :  { %v3436_v23 = vand.u32 3, %v634_v13  ;;  %v834_v18 = vsel %vm751_vm15, %v833_v21, %v832_v39  ;;  %v937_v10 = vxor.u32 2147483648, %v936_v37  ;;  %v2134_v63 = vpop.eup %2133  ;;  %2139 = vsinq.f32 %v733_v22 }
 0x291   :  { %v836_v3 = vsel %vm751_vm15, %v835_v35, %v3095_v1  ;;  %v1040_v46 = vmul.f32 %v1039_v50, %v1037_v40  ;;  %v1332_v11 = vshll.u32 %v3423_v26, 30  ;;  %v2136_v15 = vpop.eup %2135  ;;  %v3441_v52 = vadd.f32 %v363_v59, %v4386_v49  ;;  %v3471_v40 = vpop.permute.xlu0 %1412 }
 0x292   :  { %v738_v16 = vadd.s32 3, %v734_v36  ;;  %v4387_v28 = vand.u32 2147483647, %v4385_v14  ;;  %v3449_v39 = vsel %vm2045_vm0, 0, %v2044_v43  ;;  %v3452_v4 = vadd.f32 %v364_v42, %v4390_v24 }
 0x293   :  { %vm855_vm2 = vcmp.lt.s32.totalorder %v4391_v44, 0  ;;  %v1138_v13 = vadd.s32 127, %v1137_v29  ;;  %vm637_vm3 = vcmp.eq.s32.totalorder %v3436_v23, 0  ;;  %vm640_vm4 = vcmp.eq.s32.totalorder %v3436_v23, 2 }
 0x294   :  { %vm3445_vm1 = vcmp.le.f32.partialorder %v4387_v28, 0.7853982  ;;  %v938_v41 = vsel %vm855_vm2, %v937_v10, %v936_v37  ;;  %v1041_v43 = vxor.u32 2147483648, %v1040_v46  ;;  %v1133_v9 = vsub.s32 32, %v3419_v48 }
 0x295   :  { %v837_v1 = vsel %vm3445_vm1, %v4385_v14, %v834_v18  ;;  %v838_v45 = vsel %vm3445_vm1, 0, %v836_v3  ;;  %v1241_v22 = vsub.s32 4294967266, %v3449_v39  ;;  %v3467_v21 = vsub.s32 %v3387_v32, %v1332_v11 }
 0x296   :  { %v638_v47 = vxor.u32 2147483648, %v2136_v15  ;;  %v641_v59 = vxor.u32 2147483648, %v2134_v63  ;;  %v3469_v35 = vand.u32 3, %v738_v16  ;;  %2141 = vcosq.f32 %v837_v1 }
 0x297   :  { %2143 = vsinq.f32 %v837_v1  ;;  %v4392_v61 = vand.u32 2147483647, %v4391_v44  ;;  %v1117_v42 = vadd.s32 %v3137_v30, %v3148_v60  ;;  %v1139_v2 = vshll.u32 %v1138_v13, 23 }
 0x298   :  { %v842_v32 = vadd.s32 3, %v838_v45  ;;  %v939_v36 = vsub.s32 4, %v3133_v0  ;;  %vm959_vm6 = vcmp.lt.s32.totalorder %v2474_v17, 0  ;;  %v2138_v29 = vpop.eup %2137  ;;  %v1242_v3 = vadd.s32 127, %v1241_v22  ;;  %v3509_v45 = vpop.permute.xlu0 %1440 }
 0x299   :  { %vm3475_vm5 = vcmp.le.f32.partialorder %v4392_v61, 0.7853982  ;;  %v1042_v18 = vsel %vm959_vm6, %v1041_v43, %v1040_v46  ;;  %v1135_v10 = vshrl.u32 %v1117_v42, %v1133_v9  ;;  %v1335_v11 = vsub.s32 0, %v3467_v21 }
 0x29a   :  { %v941_v50 = vsel %vm3475_vm5, %v4391_v44, %v938_v41  ;;  %v639_v30 = vsel %vm637_vm3, %v2134_v63, %v638_v47  ;;  %v642_v60 = vsel %vm640_vm4, %v641_v59, %v2136_v15  ;;  %v4395_v49 = vand.u32 2147483647, %v2474_v17  ;;  %v2140_v62 = vpop.eup %2139 }
 0x29b   :  { %v1043_v28 = vsub.s32 4, %v3162_v25  ;;  %2145 = vcosq.f32 %v941_v50  ;;  %v1134_v46 = vshll.u32 %v3309_v56, %v3419_v48  ;;  %v1140_v24 = vor.u32 4788187, %v1139_v2 }
 0x29c   :  { %vm3495_vm7 = vcmp.le.f32.partialorder %v4395_v49, 0.7853982  ;;  %v1237_v1 = vsub.s32 32, %v3449_v39  ;;  %v745_v63 = vxor.u32 2147483648, %v2138_v29  ;;  %v940_v15 = vsel %vm855_vm2, %v939_v36, %v3133_v0 }
 0x29d   :  { %2147 = vsinq.f32 %v941_v50  ;;  %v1045_v13 = vsel %vm3495_vm7, %v2474_v17, %v1042_v18  ;;  %v1136_v41 = vor.u32 %v1135_v10, %v1134_v46  ;;  %v1221_v43 = vadd.s32 %v3233_v7, %v3222_v54 }
 0x29e   :  { %v1243_v56 = vshll.u32 %v1242_v3, 23  ;;  %v2047_v48 = vmin.u32 %v1335_v11, %v3467_v21  ;;  %vm636_vm8 = vcmp.lt.s32.totalorder %v3436_v23, 2  ;;  %vm741_vm9 = vcmp.eq.s32.totalorder %v3469_v35, 0  ;;  %v4398_v3 = vld [vmem:[#allocation38_spill] sm:$0xff] }
 0x29f   :  { %v742_v9 = vxor.u32 2147483648, %v2140_v62  ;;  %vm744_vm10 = vcmp.eq.s32.totalorder %v3469_v35, 2  ;;  %v942_v0 = vsel %vm3475_vm5, 0, %v940_v15  ;;  %v1044_v22 = vsel %vm959_vm6, %v1043_v28, %v3162_v25 }
 0x2a0   :  { %v1141_v47 = vand.u32 2147483647, %v1140_v24  ;;  %v1239_v59 = vshrl.u32 %v1221_v43, %v1237_v1  ;;  %v2142_v54 = vpop.eup %2141  ;;  %v643_v7 = vsel %vm636_vm8, %v639_v30, %v642_v60  ;;  %v746_v61 = vsel %vm744_vm10, %v745_v63, %v2140_v62  ;;  %v4399_v1 = vld [vmem:[#allocation21_spill] sm:$0xff] }
 0x2a1   :  { %v843_v42 = vand.u32 3, %v842_v32  ;;  %2149 = vcosq.f32 %v1045_v13  ;;  %v2144_v23 = vpop.eup %2143  ;;  %v1143_v2 = vcvt.s32.f32 %v1136_v41  ;;  %v1238_v36 = vshll.u32 %v3337_v33, %v3449_v39  ;;  %v3532_v32 = vpop.permute.xlu0 %436 }
 0x2a2   :  { %v1244_v50 = vor.u32 4788187, %v1243_v56  ;;  %v1337_v18 = vclz %v2047_v48  ;;  %v743_v37 = vsel %vm741_vm9, %v2138_v29, %v742_v9  ;;  %v946_v10 = vadd.s32 3, %v942_v0  ;;  %v3535_v39 = vpop.permute.xlu1 %376 }
 0x2a3   :  { %v1046_v25 = vsel %vm3495_vm7, 0, %v1044_v22  ;;  %2151 = vsinq.f32 %v1045_v13  ;;  %v3530_v11 = vadd.f32 %v3427_v19, %v4398_v3  ;;  %vm633_vm11 = vweird.f32 %v4369_v53 }
 0x2a4   :  { %v1144_v30 = vmul.f32 %v1143_v2, %v1141_v47  ;;  %v1240_v33 = vor.u32 %v1239_v59, %v1238_v36  ;;  %v3537_v60 = vsel %vm633_vm11, nan, %v643_v7  ;;  %vm740_vm12 = vcmp.lt.s32.totalorder %v3469_v35, 2 }
 0x2a5   :  { %v846_v29 = vxor.u32 2147483648, %v2144_v23  ;;  %v849_v49 = vxor.u32 2147483648, %v2142_v54  ;;  %v2146_v16 = vpop.eup %2145  ;;  %v747_v28 = vsel %vm740_vm12, %v743_v37, %v746_v61  ;;  %v1050_v62 = vadd.s32 3, %v1046_v25  ;;  %v3548_v56 = vpop.permute.xlu0 %1476  ;;  %v2183_v61 = vld [vmem:[%s4219_s0] sm:$0x77] }
 0x2a6   :  { %v1245_v46 = vand.u32 2147483647, %v1244_v50  ;;  %v2048_v19 = vadd.s32 4294967294, %v1337_v18  ;;  %vm737_vm13 = vweird.f32 %v4374_v51  ;;  %vm844_vm14 = vcmp.lt.s32.totalorder %v843_v42, 2  ;;  %v3552_v0 = vpop.permute.xlu1 %380 }
 0x2a7   :  { %v2148_v24 = vpop.eup %2147  ;;  %vm845_vm15 = vcmp.eq.s32.totalorder %v843_v42, 0  ;;  %v947_v53 = vand.u32 3, %v946_v10  ;;  %vm848_vm0 = vcmp.eq.s32.totalorder %v843_v42, 2  ;;  %v3543_v63 = vrot.slane %v3537_v60, %v4399_v1  ;;  %v2184_v10 = vld [vmem:[%s4219_s0 + $0x8] sm:$0x77] }
 0x2a8   :  { %v1145_v15 = vxor.u32 2147483648, %v1144_v30  ;;  %v1247_v35 = vcvt.s32.f32 %v1240_v33  ;;  %v3545_v13 = vsel %vm737_vm13, nan, %v747_v28  ;;  %v847_v41 = vsel %vm845_vm15, %v2142_v54, %v846_v29 }
 0x2a9   :  { %v850_v43 = vsel %vm848_vm0, %v849_v49, %v2144_v23  ;;  %vm1063_vm1 = vcmp.lt.s32.totalorder %v2517_v8, 0  ;;  %v953_v48 = vxor.u32 2147483648, %v2146_v16  ;;  %v3550_v51 = vand.u32 3, %v1050_v62  ;;  %v4403_v23 = vld [vmem:[#allocation13_spill] sm:$0xff] }
 0x2aa   :  { %v1248_v9 = vmul.f32 %v1247_v35, %v1245_v46  ;;  %vm2049_vm2 = vcmp.lt.s32.totalorder %v2048_v19, 0  ;;  %vm948_vm3 = vcmp.lt.s32.totalorder %v947_v53, 2  ;;  %vm949_vm4 = vcmp.eq.s32.totalorder %v947_v53, 0  ;;  %v3584_v46 = vpop.permute.xlu0 %1536 }
 0x2ab   :  { %v2150_v22 = vpop.eup %2149  ;;  %v950_v47 = vxor.u32 2147483648, %v2148_v24  ;;  %vm952_vm5 = vcmp.eq.s32.totalorder %v947_v53, 2  ;;  %v4400_v59 = vand.u32 2147483647, %v2517_v8  ;;  %v1146_v7 = vsel %vm1063_vm1, %v1145_v15, %v1144_v30 }
 0x2ac   :  { %v386_v2 = vrot.slane %v2183_v61, %v4403_v23  ;;  %v390_v36 = vrot.slane %v2183_v61, %v4399_v1  ;;  %vm841_vm7 = vweird.f32 %v4385_v14  ;;  %v851_v18 = vsel %vm844_vm14, %v847_v41, %v850_v43  ;;  %v3593_v41 = vpop.permute.xlu1 %440 }
 0x2ad   :  { %vm3556_vm6 = vcmp.le.f32.partialorder %v4400_v59, 0.7853982  ;;  %v2152_v50 = vpop.eup %2151  ;;  %v3569_v37 = vsel %vm2049_vm2, 0, %v2048_v19  ;;  %v394_v25 = vrot.slane %v2184_v10, %v4403_v23  ;;  %v398_v3 = vrot.slane %v2184_v10, %v4399_v1 }
 0x2ae   :  { %vm945_vm8 = vweird.f32 %v4391_v44  ;;  %v954_v30 = vsel %vm952_vm5, %v953_v48, %v2148_v24  ;;  %vm1053_vm9 = vcmp.eq.s32.totalorder %v3550_v51, 0  ;;  %v1147_v33 = vsub.s32 4, %v3270_v6 }
 0x2af   :  { %v1249_v29 = vxor.u32 2147483648, %v1248_v9  ;;  %v951_v42 = vsel %vm949_vm4, %v2146_v16, %v950_v47  ;;  %v1057_v49 = vxor.u32 2147483648, %v2150_v22  ;;  %v1149_v28 = vsel %vm3556_vm6, %v2517_v8, %v1146_v7 }
 0x2b0   :  { %v1251_v62 = vsub.s32 4, %v3294_v57  ;;  %v1054_v19 = vxor.u32 2147483648, %v2152_v50  ;;  %v1345_v15 = vsub.s32 4294967266, %v3569_v37  ;;  %v3588_v24 = vrot.slane %v386_v2, %v4403_v23 }
 0x2b1   :  { %v3591_v35 = vrot.slane %v390_v36, %v4403_v23  ;;  %vm1056_vm10 = vcmp.eq.s32.totalorder %v3550_v51, 2  ;;  %vm1167_vm11 = vcmp.lt.s32.totalorder %v2538_v20, 0  ;;  %v3598_v16 = vrot.slane %v394_v25, %v4403_v23 }
 0x2b2   :  { %v3601_v43 = vrot.slane %v398_v3, %v4403_v23  ;;  %v1148_v48 = vsel %vm1063_vm1, %v1147_v33, %v3270_v6  ;;  %2153 = vcosq.f32 %v1149_v28  ;;  %v4404_v47 = vand.u32 2147483647, %v2538_v20 }
 0x2b3   :  { %v1250_v7 = vsel %vm1167_vm11, %v1249_v29, %v1248_v9  ;;  %v955_v61 = vsel %vm948_vm3, %v951_v42, %v954_v30  ;;  %v1058_v2 = vsel %vm1056_vm10, %v1057_v49, %v2152_v50  ;;  %2155 = vsinq.f32 %v1149_v28  ;;  %v3639_v29 = vpop.permute.xlu1 %1408 }
 0x2b4   :  { %vm3608_vm12 = vcmp.le.f32.partialorder %v4404_v47, 0.7853982  ;;  %v1252_v36 = vsel %vm1167_vm11, %v1251_v62, %v3294_v57  ;;  %v1055_v23 = vsel %vm1053_vm9, %v2150_v22, %v1054_v19  ;;  %v1346_v10 = vadd.s32 127, %v1345_v15  ;;  %v1573_v22 = vpop.permute.xlu0 %1572  ;;  %v4410_v47 = vld [vmem:[#allocation39_spill] sm:$0xff] }
 0x2b5   :  { %v419_v6 = vmul.f32 %v3588_v24, %v3535_v39  ;;  %v420_v25 = vmul.f32 %v3591_v35, %v3535_v39  ;;  %v3622_v3 = vrot.slane %v3545_v13, %v4399_v1  ;;  %v1253_v53 = vsel %vm3608_vm12, %v2538_v20, %v1250_v7 }
 0x2b6   :  { %v421_v57 = vmul.f32 %v3598_v16, %v3535_v39  ;;  %v422_v9 = vmul.f32 %v3601_v43, %v3535_v39  ;;  %v3633_v50 = vsel %vm841_vm7, nan, %v851_v18  ;;  %vm1052_vm13 = vcmp.lt.s32.totalorder %v3550_v51, 2  ;;  %v4409_v18 = vld [vmem:[#allocation45_spill] sm:$0xff] }
 0x2b7   :  { %4407 = vst [vmem:[#allocation32_spill] sm:$0xff] %v3633_v50  ;;  %v1150_v30 = vsel %vm3556_vm6, 0, %v1148_v48  ;;  %v1341_v33 = vsub.s32 32, %v3569_v37  ;;  %v3643_v42 = vsel %vm945_vm8, nan, %v955_v61  ;;  %v1059_v49 = vsel %vm1052_vm13, %v1055_v23, %v1058_v2 }
 0x2b8   :  { %4408 = vst [vmem:[#allocation41_spill] sm:$0xff] %v3643_v42  ;;  %v1254_v39 = vsel %vm3608_vm12, 0, %v1252_v36  ;;  %v1325_v14 = vadd.s32 %v3348_v34, %v3346_v27  ;;  %2157 = vcosq.f32 %v1253_v53  ;;  %v1347_v51 = vshll.u32 %v1346_v10, 23  ;;  %v3658_v34 = vpop.permute.xlu1 %1375  ;;  %v3673_v61 = vpop.permute.xlu0 %1632 }
 0x2b9   :  { %v427_v54 = vadd.f32 %v419_v6, %v4409_v18  ;;  %v428_v28 = vadd.f32 %v420_v25, %v3298_v58  ;;  %v1154_v62 = vadd.s32 3, %v1150_v30  ;;  %2159 = vsinq.f32 %v1253_v53 }
 0x2ba   :  { %v429_v19 = vadd.f32 %v421_v57, %v3401_v31  ;;  %v430_v44 = vadd.f32 %v422_v9, %v3405_v55  ;;  %v3655_v15 = vrot.slane %v3633_v50, %v4399_v1  ;;  %vm1049_vm14 = vweird.f32 %v2474_v17 }
 0x2bb   :  { %v1258_v48 = vadd.s32 3, %v1254_v39  ;;  %v1343_v27 = vshrl.u32 %v1325_v14, %v1341_v33  ;;  %v3662_v59 = vadd.f32 %v3434_v5, %v4410_v47  ;;  %v3666_v58 = vrot.slane %v3643_v42, %v4399_v1 }
 0x2bc   :  { %v3669_v31 = vmul.f32 %v3543_v63, %v1573_v22  ;;  %v3671_v55 = vsel %vm1049_vm14, nan, %v1059_v49  ;;  %v2154_v7 = vpop.eup %2153  ;;  %v1342_v17 = vshll.u32 %v3467_v21, %v3569_v37  ;;  %v1348_v2 = vor.u32 4788187, %v1347_v51  ;;  %v4416_v49 = vld [vmem:[#allocation6_spill] sm:$0xff] }
 0x2bd   :  { %4412 = vst [vmem:[#allocation31_spill] sm:$0xff] %v3671_v55  ;;  %v443_v36 = vadd.f32 %v3532_v32, %v427_v54  ;;  %v444_v5 = vadd.f32 %v3532_v32, %v428_v28  ;;  %v2156_v23 = vpop.eup %2155  ;;  %v3680_v10 = vmul.f32 %v3622_v3, %v1573_v22  ;;  %v1155_v6 = vand.u32 3, %v1154_v62  ;;  %v3702_v54 = vpop.permute.xlu1 %1380 }
 0x2be   :  { %4411 = vst [vmem:[#allocation40_spill] sm:$0xff] %v3669_v31  ;;  %v445_v25 = vadd.f32 %v3532_v32, %v429_v19  ;;  %v446_v53 = vadd.f32 %v3532_v32, %v430_v44  ;;  %v3685_v57 = vmul.f32 %v3655_v15, %v1573_v22  ;;  %v3687_v9 = vand.u32 3, %v1258_v48  ;;  %v3716_v48 = vpop.permute.xlu0 %140 }
 0x2bf   :  { %4413 = vst [vmem:[#allocation33_spill] sm:$0xff] %v3680_v10  ;;  %vm1271_vm15 = vcmp.lt.s32.totalorder %v4366_v12, 0  ;;  %v1344_v21 = vor.u32 %v1343_v27, %v1342_v17  ;;  %v3691_v37 = vmul.f32 %v3666_v58, %v1573_v22  ;;  %v1161_v30 = vxor.u32 2147483648, %v2154_v7 }
 0x2c0   :  { %4414 = vst [vmem:[#allocation43_spill] sm:$0xff] %v3685_v57  ;;  %v1355_v33 = vsub.s32 4, %v3423_v26  ;;  %v3696_v39 = vrot.slane %v3671_v55, %v4416_v49  ;;  %v1158_v14 = vxor.u32 2147483648, %v2156_v23  ;;  %v1349_v32 = vand.u32 2147483647, %v1348_v2 }
 0x2c1   :  { %4415 = vst [vmem:[#allocation12_spill] sm:$0xff] %v3691_v37  ;;  %v3698_v51 = vmax.f32 %v443_v36, 0.0  ;;  %v3700_v18 = vmax.f32 %v444_v5, 0.0  ;;  %vm1156_vm0 = vcmp.lt.s32.totalorder %v1155_v6, 2  ;;  %vm1157_vm1 = vcmp.eq.s32.totalorder %v1155_v6, 0  ;;  %v4420_v5 = vld [vmem:[#allocation20_spill] sm:$0xff]  ;;  %v3745_v55 = vpop.permute.xlu1 %1444 }
 0x2c2   :  { %4417 = vst [vmem:[#allocation42_spill] sm:$0xff] %v3696_v39  ;;  %v3704_v28 = vmax.f32 %v445_v25, 0.0  ;;  %v3706_v22 = vmax.f32 %v446_v53, 0.0  ;;  %v2158_v62 = vpop.eup %2157  ;;  %vm1153_vm2 = vweird.f32 %v2517_v8  ;;  %vm1160_vm3 = vcmp.eq.s32.totalorder %v1155_v6, 2  ;;  %v4421_v53 = vld [vmem:[#allocation8_spill] sm:$0xff] }
 0x2c3   :  { %vm1261_vm4 = vcmp.eq.s32.totalorder %v3687_v9, 0  ;;  %vm3712_vm5 = vcmp.le.f32.partialorder %v1269_v38, 0.7853982  ;;  %v1351_v44 = vcvt.s32.f32 %v1344_v21  ;;  %v2160_v27 = vpop.eup %2159  ;;  %v1162_v47 = vsel %vm1160_vm3, %v1161_v30, %v2156_v23  ;;  %v4423_v30 = vld [vmem:[#allocation11_spill] sm:$0xff] }
 0x2c4   :  { %vm1264_vm6 = vcmp.eq.s32.totalorder %v3687_v9, 2  ;;  %v1356_v17 = vsel %vm1271_vm15, %v1355_v33, %v3423_v26  ;;  %v3724_v2 = vmul.f32 %v3696_v39, %v3673_v61  ;;  %v1159_v36 = vsel %vm1157_vm1, %v2154_v7, %v1158_v14 }
 0x2c5   :  { %vm1260_vm7 = vcmp.lt.s32.totalorder %v3687_v9, 2  ;;  %v1352_v38 = vmul.f32 %v1351_v44, %v1349_v32  ;;  %v1418_v25 = vrot.slane %v3698_v51, %v4420_v5  ;;  %v1422_v23 = vrot.slane %v3700_v18, %v4420_v5  ;;  %v4431_v9 = vld [vmem:[#allocation16_spill] sm:$0xff] }
 0x2c6   :  { %v3733_v21 = vmul.f32 %v3716_v48, %v4421_v53  ;;  %v3737_v26 = vmul.f32 %v3716_v48, %v4423_v30  ;;  %v1426_v7 = vrot.slane %v3704_v28, %v4420_v5  ;;  %v1430_v33 = vrot.slane %v3706_v22, %v4420_v5 }
 0x2c7   :  { %v1262_v14 = vxor.u32 2147483648, %v2160_v27  ;;  %v1265_v32 = vxor.u32 2147483648, %v2158_v62  ;;  %v423_v44 = vmul.f32 %v3588_v24, %v3552_v0  ;;  %vm1703_vm8 = vcmask 1045504  }
 0x2c8   :  { %4422 = vst [vmem:[#allocation19_spill] sm:$0xff] %v3733_v21  ;;  %4424 = vst [vmem:[#allocation34_spill] sm:$0xff] %v3737_v26  ;;  %v1163_v53 = vsel %vm1156_vm0, %v1159_v36, %v1162_v47  ;;  %vm1257_vm9 = vweird.f32 %v2538_v20  ;;  %v1358_v30 = vsel %vm3712_vm5, 0, %v1356_v17  ;;  %v424_v26 = vmul.f32 %v3591_v35, %v3552_v0 }
 0x2c9   :  { %v425_v5 = vmul.f32 %v3598_v16, %v3552_v0  ;;  %v1353_v21 = vxor.u32 2147483648, %v1352_v38  ;;  %v426_v24 = vmul.f32 %v3601_v43, %v3552_v0  ;;  %v1431_v37 = vmul.f32 %v1418_v25, %v3639_v29 }
 0x2ca   :  { %v1432_v6 = vmul.f32 %v1422_v23, %v3639_v29  ;;  %v1433_v47 = vmul.f32 %v1426_v7, %v3639_v29  ;;  %v1434_v36 = vmul.f32 %v1430_v33, %v3639_v29  ;;  %v3762_v17 = vmul.f32 %v1418_v25, %v3471_v40 }
 0x2cb   :  { %v3765_v35 = vmul.f32 %v1422_v23, %v3471_v40  ;;  %v1263_v16 = vsel %vm1261_vm4, %v2158_v62, %v1262_v14  ;;  %v1266_v0 = vsel %vm1264_vm6, %v1265_v32, %v2160_v27  ;;  %v3772_v43 = vmul.f32 %v1426_v7, %v3471_v40  ;;  %v3787_v32 = vpop.permute.xlu1 %1472 }
 0x2cc   :  { %4425 = vst [vmem:[#allocation44_spill] sm:$0xff] %v3762_v17  ;;  %v3775_v57 = vmul.f32 %v1430_v33, %v3471_v40  ;;  %v3779_v29 = vsel %vm1153_vm2, nan, %v1163_v53  ;;  %v1362_v25 = vadd.s32 3, %v1358_v30  ;;  %v431_v23 = vadd.f32 %v423_v44, %v3441_v52 }
 0x2cd   :  { %4426 = vst [vmem:[#allocation35_spill] sm:$0xff] %v3765_v35  ;;  %4427 = vst [vmem:[#allocation23_spill] sm:$0xff] %v3772_v43  ;;  %v432_v10 = vadd.f32 %v424_v26, %v3452_v4  ;;  %v1354_v62 = vsel %vm1271_vm15, %v1353_v21, %v1352_v38  ;;  %v433_v27 = vadd.f32 %v425_v5, %v3530_v11  ;;  %v1704_v14 = vrot.slane %v1431_v37, 2 }
 0x2ce   :  { %4428 = vst [vmem:[#allocation30_spill] sm:$0xff] %v3775_v57  ;;  %4429 = vst [vmem:[#allocation29_spill] sm:$0xff] %v3779_v29  ;;  %v434_v7 = vadd.f32 %v426_v24, %v3662_v59  ;;  %v1267_v8 = vsel %vm1260_vm7, %v1263_v16, %v1266_v0  ;;  %v4287_v40 = vrot.slane %v3762_v17, 2  ;;  %v1707_v33 = vrot.slane %v1432_v6, 2  ;;  %v4434_v6 = vld [vmem:[#allocation17_spill] sm:$0xff] }
 0x2cf   :  { %v4286_v52 = vrot.slane %v3765_v35, 2  ;;  %v1710_v44 = vrot.slane %v1433_v47, 2  ;;  %v4285_v4 = vrot.slane %v3772_v43, 2  ;;  %v1713_v26 = vrot.slane %v1434_v36, 2  ;;  %v4436_v36 = vld [vmem:[#allocation5_spill] sm:$0xff]  ;;  %v3843_v0 = vpop.permute.xlu1 %1504 }
 0x2d0   :  { %v4284_v38 = vrot.slane %v3775_v57, 2  ;;  %v1357_v11 = vsel %vm3712_vm5, %v4366_v12, %v1354_v62  ;;  %v3800_v59 = vrot.slane %v3779_v29, %v4416_v49  ;;  %v3804_v37 = vmul.f32 %v3716_v48, %v4431_v9 }
 0x2d1   :  { %v3807_v21 = vadd.f32 %v3593_v41, %v431_v23  ;;  %v3811_v53 = vsel %vm1257_vm9, nan, %v1267_v8  ;;  %v3814_v30 = vadd.f32 %v3593_v41, %v432_v10  ;;  %v3817_v19 = vadd.f32 %v3593_v41, %v433_v27  ;;  %v4438_v8 = vld [vmem:[#allocation22_spill] sm:$0xff] }
 0x2d2   :  { %4430 = vst [vmem:[#allocation24_spill] sm:$0xff] %v3800_v59  ;;  %4432 = vst [vmem:[#allocation36_spill] sm:$0xff] %v3804_v37  ;;  %v3820_v5 = vadd.f32 %v3593_v41, %v434_v7  ;;  %v3822_v24 = vand.u32 3, %v1362_v25  ;;  %v3826_v47 = vmul.f32 %v3716_v48, %v4434_v6  ;;  %v1706_v20 = vsel %vm1703_vm8, %v1704_v14, %v4287_v40  ;;  %v4441_v6 = vld [vmem:[#allocation28_spill] sm:$0xff] }
 0x2d3   :  { %4433 = vst [vmem:[#allocation37_spill] sm:$0xff] %v3811_v53  ;;  %v3832_v16 = vsub.s32 7, %v4436_v36  ;;  %2161 = vcosq.f32 %v1357_v11  ;;  %v1709_v10 = vsel %vm1703_vm8, %v1707_v33, %v4286_v52  ;;  %v1712_v41 = vsel %vm1703_vm8, %v1710_v44, %v4285_v4  ;;  %v4439_v44 = vld [vmem:[#allocation26_spill] sm:$0xff]  ;;  %v3893_v27 = vpop.permute.xlu1 %1508 }
 0x2d4   :  { %4435 = vst [vmem:[#allocation25_spill] sm:$0xff] %v3826_v47  ;;  %v1715_v48 = vsel %vm1703_vm8, %v1713_v26, %v4284_v38  ;;  %2163 = vsinq.f32 %v1357_v11  ;;  %v3847_v25 = vrot.slane %v3811_v53, %v4416_v49  ;;  %v3851_v23 = vmul.f32 %v3800_v59, %v3673_v61  ;;  %v4440_v11 = vld [vmem:[#allocation27_spill] sm:$0xff]  ;;  %v4442_v38 = vld [vmem:[#allocation18_spill] sm:$0xff] }
 0x2d5   :  { %v3858_v33 = vadd.f32 %v1706_v20, %v4438_v8  ;;  %v3861_v26 = vadd.f32 %v1709_v10, %v4439_v44  ;;  %v3864_v9 = vadd.f32 %v1712_v41, %v4440_v11  ;;  %v3867_v36 = vadd.f32 %v1715_v48, %v4441_v6 }
 0x2d6   :  { %4437 = vst [vmem:[#allocation38_spill] sm:$0xff] %v3847_v25  ;;  %v1386_v4 = vrot.slane %v3698_v51, %v4442_v38  ;;  %v1390_v52 = vrot.slane %v3700_v18, %v4442_v38  ;;  %v1394_v40 = vrot.slane %v3704_v28, %v4442_v38  ;;  %v1450_v20 = vrot.slane %v3698_v51, %v4399_v1 }
 0x2d7   :  { %v1454_v10 = vrot.slane %v3700_v18, %v4399_v1  ;;  %v3881_v41 = vmul.f32 %v3847_v25, %v3673_v61  ;;  %v1398_v48 = vrot.slane %v3706_v22, %v4442_v38  ;;  %v1482_v44 = vrot.slane %v3698_v51, %v3832_v16 }
 0x2d8   :  { %v1399_v8 = vmul.f32 %v1386_v4, %v3658_v34  ;;  %v1400_v11 = vmul.f32 %v1390_v52, %v3658_v34  ;;  %v1463_v6 = vmul.f32 %v1450_v20, %v3509_v45  ;;  %v1486_v7 = vrot.slane %v3700_v18, %v3832_v16 }
 0x2d9   :  { %v1464_v14 = vmul.f32 %v1454_v10, %v3509_v45  ;;  %v1401_v62 = vmul.f32 %v1394_v40, %v3658_v34  ;;  %v1458_v38 = vrot.slane %v3704_v28, %v4399_v1  ;;  %v1462_v57 = vrot.slane %v3706_v22, %v4399_v1 }
 0x2da   :  { %v1490_v51 = vrot.slane %v3704_v28, %v3832_v16  ;;  %v1402_v43 = vmul.f32 %v1398_v48, %v3658_v34  ;;  %v1403_v35 = vmul.f32 %v1386_v4, %v3702_v54  ;;  %v1404_v17 = vmul.f32 %v1390_v52, %v3702_v54 }
 0x2db   :  { %v1494_v18 = vrot.slane %v3706_v22, %v3832_v16  ;;  %vm1365_vm10 = vcmp.eq.s32.totalorder %v3822_v24, 0  ;;  %vm1368_vm11 = vcmp.eq.s32.totalorder %v3822_v24, 2  ;;  %v1465_v47 = vmul.f32 %v1458_v38, %v3509_v45 }
 0x2dc   :  { %v1466_v1 = vmul.f32 %v1462_v57, %v3509_v45  ;;  %v1495_v37 = vmul.f32 %v1482_v44, %v3787_v32  ;;  %v3913_v28 = vmul.f32 %v1482_v44, %v3548_v56  ;;  %v1732_v4 = vadd.f32 %v1463_v6, %v1399_v8 }
 0x2dd   :  { %v2162_v34 = vpop.eup %2161  ;;  %v3915_v53 = vadd.f32 %v1464_v14, %v1400_v11  ;;  %v1496_v52 = vmul.f32 %v1486_v7, %v3787_v32  ;;  %v3919_v22 = vmul.f32 %v1486_v7, %v3548_v56  ;;  %v1405_v31 = vmul.f32 %v1394_v40, %v3702_v54  ;;  %v1541_v11 = vpop.permute.xlu1 %1540 }
 0x2de   :  { %v2164_v29 = vpop.eup %2163  ;;  %v1406_v25 = vmul.f32 %v1398_v48, %v3702_v54  ;;  %v1497_v45 = vmul.f32 %v1490_v51, %v3787_v32  ;;  %v3925_v59 = vmul.f32 %v1490_v51, %v3548_v56  ;;  %vm1364_vm12 = vcmp.lt.s32.totalorder %v3822_v24, 2 }
 0x2df   :  { %v1467_v14 = vmul.f32 %v1450_v20, %v3745_v55  ;;  %v1468_v8 = vmul.f32 %v1454_v10, %v3745_v55  ;;  %v1498_v44 = vmul.f32 %v1494_v18, %v3787_v32  ;;  %v3932_v7 = vmul.f32 %v1494_v18, %v3548_v56 }
 0x2e0   :  { %v1469_v40 = vmul.f32 %v1458_v38, %v3745_v55  ;;  %v1470_v54 = vmul.f32 %v1462_v57, %v3745_v55  ;;  %v1748_v48 = vrot.slane %v1495_v37, 2  ;;  %v1366_v51 = vxor.u32 2147483648, %v2164_v29 }
 0x2e1   :  { %v1369_v39 = vxor.u32 2147483648, %v2162_v34  ;;  %v1751_v42 = vrot.slane %v1496_v52, 2  ;;  %vm1361_vm13 = vweird.f32 %v4366_v12  ;;  %v1734_v10 = vadd.f32 %v1465_v47, %v1401_v62 }
 0x2e2   :  { %v1735_v32 = vadd.f32 %v1466_v1, %v1402_v43  ;;  %v1754_v50 = vrot.slane %v1497_v45, 2  ;;  %v1755_v56 = vrot.slane %v3925_v59, 2  ;;  %v3940_v18 = vadd.f32 %v1467_v14, %v1403_v35  ;;  %v1569_v45 = vpop.permute.xlu1 %1568 }
 0x2e3   :  { %v3942_v38 = vadd.f32 %v1468_v8, %v1404_v17  ;;  %v1757_v55 = vrot.slane %v1498_v44, 2  ;;  %v1758_v57 = vrot.slane %v3932_v7, 2  ;;  %v3945_v37 = vadd.f32 %v1469_v40, %v1405_v31  ;;  %v4449_v44 = vld [vmem:[#allocation9_spill] sm:$0xff] }
 0x2e4   :  { %v3947_v6 = vadd.f32 %v1470_v54, %v1406_v25  ;;  %v4443_v52 = vrot.slane %v3913_v28, 2  ;;  %v4444_v43 = vmax.f32 %v3807_v21, 0.0  ;;  %v1367_v35 = vsel %vm1365_vm10, %v2162_v34, %v1366_v51 }
 0x2e5   :  { %v1370_v17 = vsel %vm1368_vm11, %v1369_v39, %v2164_v29  ;;  %v4445_v62 = vrot.slane %v3919_v22, 2  ;;  %v4446_v25 = vmax.f32 %v3814_v30, 0.0  ;;  %v1756_v14 = vsel %vm1703_vm8, %v1754_v50, %v1755_v56 }
 0x2e6   :  { %v1750_v20 = vsel %vm1703_vm8, %v1748_v48, %v4443_v52  ;;  %v1514_v47 = vrot.slane %v4444_v43, %v4416_v49  ;;  %v4447_v8 = vmax.f32 %v3817_v19, 0.0  ;;  %v4448_v39 = vmax.f32 %v3820_v5, 0.0 }
 0x2e7   :  { %v1753_v31 = vsel %vm1703_vm8, %v1751_v42, %v4445_v62  ;;  %v1518_v1 = vrot.slane %v4446_v25, %v4416_v49  ;;  %v4450_v42 = vmov %v4444_v43  ;;  %v1759_v54 = vsel %vm1703_vm8, %v1757_v55, %v1758_v57 }
 0x2e8   :  { %v1522_v34 = vrot.slane %v4447_v8, %v4416_v49  ;;  %v1526_v29 = vrot.slane %v4448_v39, %v4416_v49  ;;  %v1546_v40 = vrot.slane %v4450_v42, %v4449_v44  ;;  %v1768_v48 = vadd.f32 %v1750_v20, %v3858_v33 }
 0x2e9   :  { %v1527_v50 = vmul.f32 %v1514_v47, %v3843_v0  ;;  %v4451_v51 = vmov %v4446_v25  ;;  %v1371_v43 = vsel %vm1364_vm12, %v1367_v35, %v1370_v17  ;;  %v1769_v62 = vadd.f32 %v1753_v31, %v3861_v26 }
 0x2ea   :  { %v1550_v52 = vrot.slane %v4451_v51, %v4449_v44  ;;  %v4452_v21 = vmov %v4447_v8  ;;  %v4453_v55 = vmov %v4448_v39  ;;  %v1770_v33 = vadd.f32 %v1756_v14, %v3864_v9  ;;  %v1601_v14 = vpop.permute.xlu1 %1600 }
 0x2eb   :  { %v1554_v25 = vrot.slane %v4452_v21, %v4449_v44  ;;  %v1558_v8 = vrot.slane %v4453_v55, %v4449_v44  ;;  %v1528_v20 = vmul.f32 %v1518_v1, %v3843_v0  ;;  %v1529_v30 = vmul.f32 %v1522_v34, %v3843_v0 }
 0x2ec   :  { %v1530_v39 = vmul.f32 %v1526_v29, %v3843_v0  ;;  %v1531_v24 = vmul.f32 %v1514_v47, %v3893_v27  ;;  %v1532_v26 = vmul.f32 %v1518_v1, %v3893_v27  ;;  %v1559_v35 = vmul.f32 %v1546_v40, %v3584_v46 }
 0x2ed   :  { %v4001_v19 = vmul.f32 %v1546_v40, %v1541_v11  ;;  %v4005_v5 = vsel %vm1361_vm13, nan, %v1371_v43  ;;  %v1776_v17 = vadd.f32 %v1732_v4, %v1527_v50  ;;  %v1560_v9 = vmul.f32 %v1550_v52, %v3584_v46 }
 0x2ee   :  { %v4008_v31 = vmul.f32 %v1550_v52, %v1541_v11  ;;  %v1561_v0 = vmul.f32 %v1554_v25, %v3584_v46  ;;  %v1562_v47 = vmul.f32 %v1558_v8, %v3584_v46  ;;  %v4012_v42 = vmul.f32 %v1554_v25, %v1541_v11 }
 0x2ef   :  { %v4014_v1 = vmul.f32 %v1558_v8, %v1541_v11  ;;  %v1777_v40 = vadd.f32 %v3915_v53, %v1528_v20  ;;  %v1778_v51 = vadd.f32 %v1734_v10, %v1529_v30  ;;  %v1533_v12 = vmul.f32 %v1522_v34, %v3893_v27  ;;  %v1605_v30 = vpop.permute.xlu1 %1604 }
 0x2f0   :  { %v1591_v4 = vmul.f32 %v3543_v63, %v1569_v45  ;;  %v1792_v50 = vrot.slane %v1559_v35, 2  ;;  %v1793_v52 = vrot.slane %v4001_v19, 2  ;;  %v1592_v43 = vmul.f32 %v3622_v3, %v1569_v45 }
 0x2f1   :  { %v1593_v21 = vmul.f32 %v3655_v15, %v1569_v45  ;;  %v1654_v46 = vrot.slane %v4005_v5, %v4416_v49  ;;  %v1534_v11 = vmul.f32 %v1526_v29, %v3893_v27  ;;  %v1795_v25 = vrot.slane %v1560_v9, 2 }
 0x2f2   :  { %v1796_v53 = vrot.slane %v4008_v31, 2  ;;  %v1798_v10 = vrot.slane %v1561_v0, 2  ;;  %v4304_v34 = vrot.slane %v4012_v42, 2  ;;  %v1801_v55 = vrot.slane %v1562_v47, 2 }
 0x2f3   :  { %v4303_v63 = vrot.slane %v4014_v1, 2  ;;  %v1771_v8 = vadd.f32 %v1759_v54, %v3867_v36  ;;  %v1779_v20 = vadd.f32 %v1735_v32, %v1530_v39  ;;  %v1594_v3 = vmul.f32 %v3666_v58, %v1569_v45 }
 0x2f4   :  { %v1820_v15 = vadd.f32 %v1776_v17, %v1591_v4  ;;  %v1780_v49 = vadd.f32 %v3940_v18, %v1531_v24  ;;  %v1794_v27 = vsel %vm1703_vm8, %v1792_v50, %v1793_v52  ;;  %v1821_v29 = vadd.f32 %v1777_v40, %v1592_v43  ;;  %v4454_v24 = vld [vmem:[#allocation32_spill] sm:$0xff] }
 0x2f5   :  { %v1822_v35 = vadd.f32 %v1778_v51, %v1593_v21  ;;  %v1658_v9 = vmul.f32 %v1654_v46, %v3673_v61  ;;  %v1781_v0 = vadd.f32 %v3942_v38, %v1532_v26  ;;  %v1782_v47 = vadd.f32 %v3945_v37, %v1533_v12  ;;  %v1637_v12 = vpop.permute.xlu1 %1636 }
 0x2f6   :  { %v1783_v36 = vadd.f32 %v3947_v6, %v1534_v11  ;;  %v1797_v58 = vsel %vm1703_vm8, %v1795_v25, %v1796_v53  ;;  %v1800_v32 = vsel %vm1703_vm8, %v1798_v10, %v4304_v34  ;;  %v1803_v18 = vsel %vm1703_vm8, %v1801_v55, %v4303_v63  ;;  %v4456_v10 = vld [vmem:[#allocation42_spill] sm:$0xff] }
 0x2f7   :  { %v1610_v61 = vrot.slane %v3537_v60, %v3832_v16  ;;  %v4049_v38 = vadd.f32 %v1794_v27, %v1768_v48  ;;  %v1823_v37 = vadd.f32 %v1779_v20, %v1594_v3  ;;  %v4052_v6 = vadd.f32 %v1820_v15, %v3724_v2  ;;  %v4455_v2 = vld [vmem:[#allocation41_spill] sm:$0xff]  ;;  %v4458_v3 = vld [vmem:[#allocation38_spill] sm:$0xff] }
 0x2f8   :  { %v1614_v45 = vrot.slane %v3545_v13, %v3832_v16  ;;  %v4057_v54 = vadd.f32 %v1821_v29, %v3851_v23  ;;  %v4060_v39 = vadd.f32 %v1822_v35, %v3881_v41  ;;  %v1618_v26 = vrot.slane %v4454_v24, %v3832_v16  ;;  %v4471_v63 = vld [vmem:[#allocation34_spill] sm:$0xff] }
 0x2f9   :  { %v1623_v17 = vmul.f32 %v1610_v61, %v1601_v14  ;;  %v1813_v60 = vadd.f32 %v1797_v58, %v1769_v62  ;;  %v1814_v48 = vadd.f32 %v1800_v32, %v1770_v33  ;;  %v4064_v40 = vadd.f32 %v1803_v18, %v1771_v8  ;;  %v4457_v8 = vld [vmem:[#allocation24_spill] sm:$0xff]  ;;  %v4460_v18 = vld [vmem:[#allocation33_spill] sm:$0xff] }
 0x2fa   :  { %v1622_v51 = vrot.slane %v4455_v2, %v3832_v16  ;;  %v1624_v4 = vmul.f32 %v1614_v45, %v1601_v14  ;;  %v4068_v13 = vmul.f32 %v1610_v61, %v1605_v30  ;;  %v4070_v23 = vmul.f32 %v1614_v45, %v1605_v30  ;;  %v4459_v58 = vld [vmem:[#allocation40_spill] sm:$0xff] }
 0x2fb   :  { %v4072_v50 = vmul.f32 %v1618_v26, %v1605_v30  ;;  %v4074_v41 = vadd.f32 %v1823_v37, %v1658_v9  ;;  %v1916_v43 = vrot.slane %v4052_v6, 2  ;;  %v1625_v21 = vmul.f32 %v1618_v26, %v1601_v14  ;;  %v4462_v6 = vld [vmem:[#allocation12_spill] sm:$0xff]  ;;  %v4463_v26 = vld [vmem:[#allocation31_spill] sm:$0xff] }
 0x2fc   :  { %v1626_v62 = vmul.f32 %v1622_v51, %v1601_v14  ;;  %v1919_v33 = vrot.slane %v4057_v54, 2  ;;  %v1922_v11 = vrot.slane %v4060_v39, 2  ;;  %v1836_v25 = vrot.slane %v1623_v17, 2  ;;  %v1665_v54 = vpop.permute.xlu1 %1664 }
 0x2fd   :  { %v4079_v16 = vmul.f32 %v1622_v51, %v1605_v30  ;;  %v1659_v55 = vmul.f32 %v4456_v10, %v1637_v12  ;;  %v1660_v20 = vmul.f32 %v4457_v8, %v1637_v12  ;;  %v1661_v15 = vmul.f32 %v4458_v3, %v1637_v12  ;;  %v4461_v30 = vld [vmem:[#allocation43_spill] sm:$0xff] }
 0x2fe   :  { %v1662_v27 = vmul.f32 %v1654_v46, %v1637_v12  ;;  %v1839_v29 = vrot.slane %v1624_v4, 2  ;;  %v4302_v35 = vrot.slane %v4068_v13, 2  ;;  %v4301_v9 = vrot.slane %v4070_v23, 2 }
 0x2ff   :  { %v4300_v14 = vrot.slane %v4072_v50, 2  ;;  %v1824_v32 = vadd.f32 %v1780_v49, %v4459_v58  ;;  %v1825_v61 = vadd.f32 %v1781_v0, %v4460_v18  ;;  %v1826_v37 = vadd.f32 %v1782_v47, %v4461_v30  ;;  %v4464_v0 = vld [vmem:[#allocation29_spill] sm:$0xff] }
 0x300   :  { %v1827_v45 = vadd.f32 %v1783_v36, %v4462_v6  ;;  %v1842_v39 = vrot.slane %v1625_v21, 2  ;;  %v1845_v24 = vrot.slane %v1626_v62, 2  ;;  %v4299_v46 = vrot.slane %v4079_v16, 2  ;;  %v4465_v36 = vld [vmem:[#allocation37_spill] sm:$0xff] }
 0x301   :  { %v1674_v17 = vrot.slane %v4463_v26, %v4449_v44  ;;  %v4094_v2 = vadd.f32 %v1824_v32, %v1659_v55  ;;  %v4096_v51 = vadd.f32 %v1825_v61, %v1660_v20  ;;  %v4098_v12 = vadd.f32 %v1826_v37, %v1661_v15  ;;  %v4466_v37 = vld [vmem:[#allocation7_spill] sm:$0xff] }
 0x302   :  { %v4100_v49 = vadd.f32 %v1827_v45, %v1662_v27  ;;  %v1678_v47 = vrot.slane %v4464_v0, %v4449_v44  ;;  %v1682_v4 = vrot.slane %v4465_v36, %v4449_v44  ;;  %v1686_v21 = vrot.slane %v4005_v5, %v4449_v44  ;;  %v251_v32 = vpop.permute.xlu0 %250  ;;  %v4467_v45 = vld [vmem:[#allocation10_spill] sm:$0xff]  ;;  %v4469_v26 = vld [vmem:[#allocation15_spill] sm:$0xff] }
 0x303   :  { %v1687_v62 = vmul.f32 %v1674_v17, %v1665_v54  ;;  %v1925_v10 = vrot.slane %v4074_v41, 2  ;;  %v1838_v55 = vsel %vm1703_vm8, %v1836_v25, %v4302_v35  ;;  %v1841_v8 = vsel %vm1703_vm8, %v1839_v29, %v4301_v9  ;;  %v4470_v35 = vld [vmem:[#allocation19_spill] sm:$0xff] }
 0x304   :  { %v1844_v20 = vsel %vm1703_vm8, %v1842_v39, %v4300_v14  ;;  %v1847_v3 = vsel %vm1703_vm8, %v1845_v24, %v4299_v46  ;;  %v1688_v44 = vmul.f32 %v1678_v47, %v1665_v54  ;;  %v1689_v5 = vmul.f32 %v1682_v4, %v1665_v54  ;;  %v4468_v24 = vld [vmem:[#allocation14_spill] sm:$0xff] }
 0x305   :  { %v1690_v15 = vmul.f32 %v1686_v21, %v1665_v54  ;;  %v1917_v41 = vrot.slane %v4094_v2, 2  ;;  %v1920_v27 = vrot.slane %v4096_v51, 2  ;;  %v1923_v25 = vrot.slane %v4098_v12, 2 }
 0x306   :  { %v1926_v58 = vrot.slane %v4100_v49, 2  ;;  %v1880_v29 = vrot.slane %v1687_v62, 2  ;;  %v1856_v18 = vadd.f32 %v1838_v55, %v4049_v38  ;;  %v1857_v61 = vadd.f32 %v1841_v8, %v1813_v60  ;;  %v4472_v38 = vld [vmem:[#allocation36_spill] sm:$0xff] }
 0x307   :  { %v1858_v30 = vadd.f32 %v1844_v20, %v1814_v48  ;;  %v253_v6 = vmul.f32 %v251_v32, %v4466_v37  ;;  %v254_v39 = vmul.f32 %v251_v32, %v4467_v45  ;;  %v255_v54 = vmul.f32 %v251_v32, %v4468_v24  ;;  %v4473_v48 = vld [vmem:[#allocation25_spill] sm:$0xff]  ;;  %v4478_v37 = vld [vmem:[#allocation23_spill] sm:$0xff]  ;;  %v4480_v45 = vld [vmem:[#allocation30_spill] sm:$0xff] }
 0x308   :  { %v256_v0 = vmul.f32 %v251_v32, %v4469_v26  ;;  %v1883_v36 = vrot.slane %v1688_v44, 2  ;;  %v1886_v46 = vrot.slane %v1689_v5, 2  ;;  %v1889_v14 = vrot.slane %v1690_v15, 2  ;;  %v4476_v5 = vld [vmem:[#allocation35_spill] sm:$0xff]  ;;  %v1669_v24 = vpop.permute.xlu0 %1668 }
 0x309   :  { %v1859_v9 = vadd.f32 %v1847_v3, %v4064_v40  ;;  %v257_v62 = vadd.f32 %v253_v6, %v4470_v35  ;;  %v258_v34 = vadd.f32 %v254_v39, %v4471_v63  ;;  %v259_v60 = vadd.f32 %v255_v54, %v4472_v38  ;;  %v4474_v35 = vld [vmem:[#allocation44_spill] sm:$0xff] }
 0x30a   :  { %v260_v55 = vadd.f32 %v256_v0, %v4473_v48  ;;  %v1918_v8 = vsel %vm1703_vm8, %v1916_v43, %v1917_v41  ;;  %v1921_v20 = vsel %vm1703_vm8, %v1919_v33, %v1920_v27  ;;  %v1924_v40 = vsel %vm1703_vm8, %v1922_v11, %v1923_v25 }
 0x30b   :  { %v1927_v63 = vsel %vm1703_vm8, %v1925_v10, %v1926_v58  ;;  %v4475_v3 = vrot.slane %v4474_v35, 2  ;;  %v4477_v15 = vrot.slane %v4476_v5, 2  ;;  %v4479_v43 = vrot.slane %v4478_v37, 2 }
 0x30c   :  { %v4481_v39 = vrot.slane %v4480_v45, 2  ;;  %v1691_v54 = vmul.f32 %v1674_v17, %v1669_v24  ;;  %v1692_v26 = vmul.f32 %v1678_v47, %v1669_v24  ;;  %v1693_v11 = vmul.f32 %v1682_v4, %v1669_v24 }
 0x30d   :  { %v1728_v44 = vadd.f32 %v4475_v3, %v257_v62  ;;  %v1729_v32 = vadd.f32 %v4477_v15, %v258_v34  ;;  %v1730_v6 = vadd.f32 %v4479_v43, %v259_v60  ;;  %v1694_v0 = vmul.f32 %v1686_v21, %v1669_v24 }
 0x30e   :  { %v1731_v33 = vadd.f32 %v4481_v39, %v260_v55  ;;  %v4482_v38 = vrot.slane %v3913_v28, 2  ;;  %v4483_v48 = vrot.slane %v3919_v22, 2  ;;  %v1881_v35 = vrot.slane %v1691_v54, 2 }
 0x30f   :  { %v1774_v34 = vadd.f32 %v1755_v56, %v1730_v6  ;;  %v1884_v3 = vrot.slane %v1692_v26, 2  ;;  %v1887_v55 = vrot.slane %v1693_v11, 2  ;;  %v1890_v5 = vrot.slane %v1694_v0, 2 }
 0x310   :  { %v1772_v10 = vadd.f32 %v4482_v38, %v1728_v44  ;;  %v1773_v62 = vadd.f32 %v4483_v48, %v1729_v32  ;;  %v1775_v60 = vadd.f32 %v1758_v57, %v1731_v33  ;;  %v4484_v47 = vrot.slane %v4012_v42, 2 }
 0x311   :  { %v4485_v4 = vrot.slane %v4014_v1, 2  ;;  %v1882_v56 = vsel %vm1703_vm8, %v1880_v29, %v1881_v35  ;;  %v1885_v7 = vsel %vm1703_vm8, %v1883_v36, %v1884_v3  ;;  %v1888_v57 = vsel %vm1703_vm8, %v1886_v46, %v1887_v55 }
 0x312   :  { %v1816_v17 = vadd.f32 %v1793_v52, %v1772_v10  ;;  %v1817_v28 = vadd.f32 %v1796_v53, %v1773_v62  ;;  %v1818_v22 = vadd.f32 %v4484_v47, %v1774_v34  ;;  %v1891_v21 = vsel %vm1703_vm8, %v1889_v14, %v1890_v5 }
 0x313   :  { %v1819_v59 = vadd.f32 %v4485_v4, %v1775_v60  ;;  %v4486_v19 = vrot.slane %v4068_v13, 2  ;;  %v4487_v31 = vrot.slane %v4070_v23, 2  ;;  %v4488_v42 = vrot.slane %v4072_v50, 2 }
 0x314   :  { %v4489_v1 = vrot.slane %v4079_v16, 2  ;;  %v1900_v32 = vadd.f32 %v1882_v56, %v1856_v18  ;;  %v1901_v29 = vadd.f32 %v1885_v7, %v1857_v61  ;;  %v1902_v37 = vadd.f32 %v1888_v57, %v1858_v30 }
 0x315   :  { %v1860_v52 = vadd.f32 %v4486_v19, %v1816_v17  ;;  %v1861_v53 = vadd.f32 %v4487_v31, %v1817_v28  ;;  %v1862_v44 = vadd.f32 %v4488_v42, %v1818_v22  ;;  %v1903_v36 = vadd.f32 %v1891_v21, %v1859_v9 }
 0x316   :  { %v1863_v15 = vadd.f32 %v4489_v1, %v1819_v59  ;;  %v1936_v45 = vadd.f32 %v1918_v8, %v1900_v32  ;;  %v1937_v13 = vadd.f32 %v1921_v20, %v1901_v29  ;;  %v1938_v39 = vadd.f32 %v1924_v40, %v1902_v37 }
 0x317   :  { %v1904_v43 = vadd.f32 %v1881_v35, %v1860_v52  ;;  %v1905_v46 = vadd.f32 %v1884_v3, %v1861_v53  ;;  %v1906_v6 = vadd.f32 %v1887_v55, %v1862_v44  ;;  %v1939_v33 = vadd.f32 %v1927_v63, %v1903_v36 }
 0x318   :  { %v1907_v14 = vadd.f32 %v1890_v5, %v1863_v15  ;;  %v1944_v18 = vmul.f32 0.5, %v1936_v45  ;;  %v1945_v61 = vmul.f32 0.5, %v1937_v13  ;;  %v1946_v9 = vmul.f32 0.5, %v1938_v39 }
 0x319   :  { %v1940_v23 = vadd.f32 %v1917_v41, %v1904_v43  ;;  %v1941_v50 = vadd.f32 %v1920_v27, %v1905_v46  ;;  %v1942_v16 = vadd.f32 %v1923_v25, %v1906_v6  ;;  %v1947_v24 = vmul.f32 0.5, %v1939_v33 }
 0x31a   :  { %v1943_v30 = vadd.f32 %v1926_v58, %v1907_v14  ;;  %2165 = vtanh.f32 %v1944_v18 }
 0x31b   :  { %v1948_v8 = vmul.f32 0.5, %v1940_v23  ;;  %v1949_v20 = vmul.f32 0.5, %v1941_v50  ;;  %2167 = vtanh.f32 %v1945_v61  ;;  %v1950_v40 = vmul.f32 0.5, %v1942_v16 }
 0x31c   :  { %2169 = vtanh.f32 %v1946_v9  ;;  %v1951_v2 = vmul.f32 0.5, %v1943_v30 }
 0x31d   :  { %2171 = vtanh.f32 %v1947_v24 }
 0x31e   :  { %2173 = vtanh.f32 %v1948_v8 }
 0x31f   :  { %2175 = vtanh.f32 %v1949_v20 }
 0x320   :  { %2177 = vtanh.f32 %v1950_v40 }
 0x321   :  { %2179 = vtanh.f32 %v1951_v2 }
 0x324   :  { %v2166_v51 = vpop.eup %2165 }
 0x325   :  { %v2168_v12 = vpop.eup %2167  ;;  %v1960_v41 = vmul.f32 0.5, %v2166_v51 }
 0x326   :  { %v2170_v27 = vpop.eup %2169  ;;  %v1961_v25 = vmul.f32 0.5, %v2168_v12 }
 0x327   :  { %v2172_v49 = vpop.eup %2171  ;;  %v1962_v58 = vmul.f32 0.5, %v2170_v27  ;;  %v1968_v0 = vadd.f32 0.5, %v1960_v41 }
 0x328   :  { %v2174_v63 = vpop.eup %2173  ;;  %v1963_v54 = vmul.f32 0.5, %v2172_v49  ;;  %v1969_v48 = vadd.f32 0.5, %v1961_v25 }
 0x329   :  { %v2176_v26 = vpop.eup %2175  ;;  %v1964_v11 = vmul.f32 0.5, %v2174_v63  ;;  %v1970_v60 = vadd.f32 0.5, %v1962_v58  ;;  %v1980_v28 = vrot.slane %v1968_v0, 2 }
 0x32a   :  { %v2178_v38 = vpop.eup %2177  ;;  %v1965_v10 = vmul.f32 0.5, %v2176_v26  ;;  %v1971_v55 = vadd.f32 0.5, %v1963_v54  ;;  %v1983_v4 = vrot.slane %v1969_v48, 2 }
 0x32b   :  { %v2180_v62 = vpop.eup %2179  ;;  %v1966_v34 = vmul.f32 0.5, %v2178_v38  ;;  %v1972_v35 = vadd.f32 0.5, %v1964_v11  ;;  %v1998_v7 = vrot.slane %v1970_v60, 2 }
 0x32c   :  { %v1967_v3 = vmul.f32 0.5, %v2180_v62  ;;  %v1973_v5 = vadd.f32 0.5, %v1965_v10  ;;  %v2001_v19 = vrot.slane %v1971_v55, 2 }
 0x32d   :  { %v1974_v17 = vadd.f32 0.5, %v1966_v34  ;;  %v1981_v47 = vrot.slane %v1972_v35, 2 }
 0x32e   :  { %v1975_v22 = vadd.f32 0.5, %v1967_v3  ;;  %v1984_v59 = vrot.slane %v1973_v5, 2 }
 0x32f   :  { %v1982_v56 = vsel %vm1703_vm8, %v1980_v28, %v1981_v47  ;;  %1992 = vst [vmem:[%s4221_s2 + $0x10] sm:$0x3] %v1981_v47  ;;  %v1999_v57 = vrot.slane %v1974_v17, 2 }
 0x330   :  { %v1985_v21 = vsel %vm1703_vm8, %v1983_v4, %v1984_v59  ;;  %1990 = vst [vmem:[%s4221_s2] sm:$0xff] %v1982_v56  ;;  %1993 = vst [vmem:[%s4221_s2 + $0x18] sm:$0x3] %v1984_v59  ;;  %v2002_v52 = vrot.slane %v1975_v22, 2 }
 0x331   :  { %1991 = vst [vmem:[%s4221_s2 + $0x8] sm:$0xff] %v1985_v21  ;;  %v2000_v31 = vsel %vm1703_vm8, %v1998_v7, %v1999_v57  ;;  %2052 = vst [vmem:[%s4221_s2 + $0x30] sm:$0x3] %v1999_v57 }
 0x332   :  { %v2003_v53 = vsel %vm1703_vm8, %v2001_v19, %v2002_v52  ;;  %2050 = vst [vmem:[%s4221_s2 + $0x20] sm:$0xff] %v2000_v31  ;;  %2053 = vst [vmem:[%s4221_s2 + $0x38] sm:$0x3] %v2002_v52 }
 0x333   :  { %2051 = vst [vmem:[%s4221_s2 + $0x28] sm:$0xff] %v2003_v53 }
 0x334   :  { %2017 = vsyncpa [#allocation3], 1 }

</bundles_post_ra>
